<compile_context>
chip_gen: v5e
topology: v5e:2x2
jax: 0.10.0
libtpu: 0.0.40
codegen_flags: <defaults>
</compile_context>

<pallas_src>
import math
from functools import partial

import jax
import jax.numpy as jnp
from jax.experimental import pallas as pl
from jax.experimental.pallas import tpu as pltpu

STATE_SIZE = 6
ACTION_SIZE = 4            # env.action_space.n for HIVPatient
NB_NEURONS = 512
NUM_LAYERS = 4

PADDED_STATE = 8           # sublane-aligned input feature width
PADDED_OUT = 128           # lane-dense output width (sliced back to 4 in-jit)


# ----------------------------- kernels ------------------------------------

def _mlp_kernel_tiled(x_ref, w1_ref, b1_ref, w2_ref, b2_ref,
                      w3_ref, b3_ref, w4_ref, b4_ref, out_ref):
    """Multi-tile path: BlockSpec pipelining; weights have a constant
    index_map so they are DMA'd once and stay VMEM-resident for all tiles."""
    bf16 = jnp.bfloat16

    # Layer 1 in f32 (unnormalized states can be ~1e5-1e6; K=8 so it's free).
    h = jnp.dot(x_ref[...], w1_ref[...], preferred_element_type=jnp.float32)
    h = jnp.maximum(h + b1_ref[...], 0.0)                       # (tb, 512) f32

    h = jnp.dot(h.astype(bf16), w2_ref[...], preferred_element_type=jnp.float32)
    h = jnp.maximum(h + b2_ref[...], 0.0)

    h = jnp.dot(h.astype(bf16), w3_ref[...], preferred_element_type=jnp.float32)
    h = jnp.maximum(h + b3_ref[...], 0.0)

    out = jnp.dot(h.astype(bf16), w4_ref[...], preferred_element_type=jnp.float32)
    out_ref[...] = (out + b4_ref[...]).astype(out_ref.dtype)    # (tb, 128)


def _mlp_kernel_single(x_ref, w1_ref, b1_ref,
                       w2_hbm, b2_ref, w3_hbm, b3_ref, w4_hbm, b4_ref,
                       out_ref,
                       w2_vmem, w3_vmem, w4_vmem, sems):
    """Single-tile (DQN act / small batch) path: one grid step means the
    BlockSpec pipeline would serialize the whole weight fetch before compute,
    so w2/w3/w4 stay in HBM and are DMA'd manually: all copies start at kernel
    entry, each is waited on right before its matmul -> DMA hidden behind the
    previous layers' compute."""
    cp2 = pltpu.make_async_copy(w2_hbm, w2_vmem, sems.at[0])
    cp3 = pltpu.make_async_copy(w3_hbm, w3_vmem, sems.at[1])
    cp4 = pltpu.make_async_copy(w4_hbm, w4_vmem, sems.at[2])
    cp2.start()
    cp3.start()
    cp4.start()

    bf16 = jnp.bfloat16

    h = jnp.dot(x_ref[...], w1_ref[...], preferred_element_type=jnp.float32)
    h = jnp.maximum(h + b1_ref[...], 0.0)

    cp2.wait()
    h = jnp.dot(h.astype(bf16), w2_vmem[...], preferred_element_type=jnp.float32)
    h = jnp.maximum(h + b2_ref[...], 0.0)

    cp3.wait()
    h = jnp.dot(h.astype(bf16), w3_vmem[...], preferred_element_type=jnp.float32)
    h = jnp.maximum(h + b3_ref[...], 0.0)

    cp4.wait()
    out = jnp.dot(h.astype(bf16), w4_vmem[...], preferred_element_type=jnp.float32)
    out_ref[...] = (out + b4_ref[...]).astype(out_ref.dtype)


# ----------------------------- wrapper ------------------------------------

def _round_up(n, m):
    return ((n + m - 1) // m) * m


_IS_V5E = None


def _is_v5e():
    global _IS_V5E
    if _IS_V5E is None:
        try:
            kind = jax.devices()[0].device_kind.lower()
        except Exception:
            kind = ""
        _IS_V5E = ("v5 lite" in kind) or ("v5e" in kind)
    return _IS_V5E


def _batch_tile_for(B):
    # v5e MXU is 4x128x128 (tb=128 fills M); v6e/v7x take 256, 512 for big B.
    if _is_v5e():
        tb = 128
    else:
        tb = 512 if B >= 2048 else 256
    return max(8, min(tb, _round_up(B, 8)))


def _cost_estimate(b_pad):
    flops = 2 * b_pad * (PADDED_STATE * NB_NEURONS
                         + 2 * NB_NEURONS * NB_NEURONS
                         + NB_NEURONS * PADDED_OUT)
    weight_bytes = (PADDED_STATE * NB_NEURONS * 4            # w1 (f32)
                    + 2 * NB_NEURONS * NB_NEURONS * 2        # w2, w3 (bf16)
                    + NB_NEURONS * PADDED_OUT * 2            # w4 (bf16)
                    + 3 * NB_NEURONS * 4 + PADDED_OUT * 4)   # biases (f32)
    bytes_accessed = weight_bytes + b_pad * (PADDED_STATE + PADDED_OUT) * 4
    return pl.CostEstimate(flops=flops, transcendentals=0,
                           bytes_accessed=bytes_accessed)


@partial(jax.jit, static_argnames=("tile", "num_tiles"))
def _forward_padded(x, w1p, b1, w2p, b2, w3p, b3, w4p, b4p, *, tile, num_tiles):
    """Padding of x, the pallas_call and the output slice all fused in one jit."""
    B = x.shape[0]
    b_pad = tile * num_tiles
    x_p = jnp.zeros((b_pad, PADDED_STATE), jnp.float32)
    x_p = x_p.at[:B, :STATE_SIZE].set(x.astype(jnp.float32))

    full = lambda i: (0, 0)       # weights/biases: same (whole) block every step
    cost = _cost_estimate(b_pad)

    if num_tiles == 1:
        # Latency path: manual DMA overlap for the big weights.
        out = pl.pallas_call(
            _mlp_kernel_single,
            out_shape=jax.ShapeDtypeStruct((b_pad, PADDED_OUT), jnp.float32),
            grid_spec=pltpu.PrefetchScalarGridSpec(
                num_scalar_prefetch=0,
                grid=(1,),
                in_specs=[
                    pl.BlockSpec((tile, PADDED_STATE), full),          # x
                    pl.BlockSpec((PADDED_STATE, NB_NEURONS), full),    # w1 (f32)
                    pl.BlockSpec((1, NB_NEURONS), full),               # b1
                    pl.BlockSpec(memory_space=pl.ANY),                 # w2 (HBM)
                    pl.BlockSpec((1, NB_NEURONS), full),               # b2
                    pl.BlockSpec(memory_space=pl.ANY),                 # w3 (HBM)
                    pl.BlockSpec((1, NB_NEURONS), full),               # b3
                    pl.BlockSpec(memory_space=pl.ANY),                 # w4 (HBM)
                    pl.BlockSpec((1, PADDED_OUT), full),               # b4
                ],
                out_specs=pl.BlockSpec((tile, PADDED_OUT), full),
                scratch_shapes=[
                    pltpu.VMEM((NB_NEURONS, NB_NEURONS), jnp.bfloat16),
                    pltpu.VMEM((NB_NEURONS, NB_NEURONS), jnp.bfloat16),
                    pltpu.VMEM((NB_NEURONS, PADDED_OUT), jnp.bfloat16),
                    pltpu.SemaphoreType.DMA((3,)),
                ]),
            compiler_params=pltpu.CompilerParams(
                dimension_semantics=("arbitrary",)),
            cost_estimate=cost,
        )(x_p, w1p, b1, w2p, b2, w3p, b3, w4p, b4p)
    else:
        # Throughput path: BlockSpec pipelining; batch axis "parallel" so v7x
        # megacore can shard the (>=2) grid steps across its two TensorCores.
        out = pl.pallas_call(
            _mlp_kernel_tiled,
            out_shape=jax.ShapeDtypeStruct((b_pad, PADDED_OUT), jnp.float32),
            grid_spec=pltpu.PrefetchScalarGridSpec(
                num_scalar_prefetch=0,
                grid=(num_tiles,),
                in_specs=[
                    pl.BlockSpec((tile, PADDED_STATE), lambda i: (i, 0)),   # x
                    pl.BlockSpec((PADDED_STATE, NB_NEURONS), full),         # w1
                    pl.BlockSpec((1, NB_NEURONS), full),                    # b1
                    pl.BlockSpec((NB_NEURONS, NB_NEURONS), full),           # w2
                    pl.BlockSpec((1, NB_NEURONS), full),                    # b2
                    pl.BlockSpec((NB_NEURONS, NB_NEURONS), full),           # w3
                    pl.BlockSpec((1, NB_NEURONS), full),                    # b3
                    pl.BlockSpec((NB_NEURONS, PADDED_OUT), full),           # w4
                    pl.BlockSpec((1, PADDED_OUT), full),                    # b4
                ],
                out_specs=pl.BlockSpec((tile, PADDED_OUT), lambda i: (i, 0)),
            ),
            compiler_params=pltpu.CompilerParams(
                dimension_semantics=("parallel",)),
            cost_estimate=cost,
        )(x_p, w1p, b1, w2p, b2, w3p, b3, w4p, b4p)

    return out[:B, :ACTION_SIZE]


def prepare_params(params):
    """One-time weight padding / casting (hoisted out of the per-call path)."""
    (w1, b1), (w2, b2), (w3, b3), (w4, b4) = params
    bf16 = jnp.bfloat16
    w1p = jnp.zeros((PADDED_STATE, NB_NEURONS), jnp.float32).at[:STATE_SIZE].set(
        w1.astype(jnp.float32))
    w4p = jnp.zeros((NB_NEURONS, PADDED_OUT), bf16).at[:, :ACTION_SIZE].set(
        w4.astype(bf16))
    b4p = jnp.zeros((1, PADDED_OUT), jnp.float32).at[:, :ACTION_SIZE].set(
        b4.astype(jnp.float32))
    return (w1p, b1.astype(jnp.float32),
            w2.astype(bf16), b2.astype(jnp.float32),
            w3.astype(bf16), b3.astype(jnp.float32),
            w4p, b4p)


class QNetworkPallas:
    """Drop-in forward for the PyTorch QNetwork (6 -> 512 -> 512 -> 512 -> 4)."""

    def __init__(self, params):
        # Pad/cast once; subsequent forwards only DMA the already-prepared
        # bf16/f32 padded weights (no per-call HBM re-materialization).
        self.padded = tuple(jax.device_put(p) for p in prepare_params(params))

    def __call__(self, x):
        B = x.shape[0]
        tile = _batch_tile_for(B)
        num_tiles = -(-B // tile)
        return _forward_padded(x, *self.padded, tile=tile, num_tiles=num_tiles)


def qnetwork_forward(x, params):
    """Functional one-shot entry (re-prepares weights; prefer QNetworkPallas)."""
    return QNetworkPallas(params)(x)


# ----------------------------- init & refs --------------------------------

def init_params(key):
    """PyTorch nn.Linear default init: U(-1/sqrt(fan_in), 1/sqrt(fan_in))."""
    dims = [STATE_SIZE, NB_NEURONS, NB_NEURONS, NB_NEURONS, ACTION_SIZE]
    params = []
    for layer in range(NUM_LAYERS):
        fan_in, fan_out = dims[layer], dims[layer + 1]
        key, kw, kb = jax.random.split(key, 3)
        bound = 1.0 / math.sqrt(fan_in)
        w = jax.random.uniform(kw, (fan_in, fan_out), jnp.float32, -bound, bound)
        b = jax.random.uniform(kb, (1, fan_out), jnp.float32, -bound, bound)
        params.append((w, b))
    return params


def qnetwork_ref_f32(x, params):
    """Pure-JAX f32 reference (matches the PyTorch module semantics)."""
    (w1, b1), (w2, b2), (w3, b3), (w4, b4) = params
    h = jnp.maximum(x @ w1 + b1, 0.0)
    h = jnp.maximum(h @ w2 + b2, 0.0)
    h = jnp.maximum(h @ w3 + b3, 0.0)
    return h @ w4 + b4


def qnetwork_ref_matched(x, params):
    """Mirror of the kernel numerics: layer 1 in f32, layers 2-4 with bf16
    operands / f32 accumulation, f32 bias + ReLU epilogues."""
    bf16 = jnp.bfloat16
    hi = jax.lax.Precision.HIGHEST
    (w1, b1), (w2, b2), (w3, b3), (w4, b4) = params
    h = jnp.maximum(jnp.dot(x, w1, precision=hi,
                            preferred_element_type=jnp.float32) + b1, 0.0)
    h = jnp.maximum(jnp.dot(h.astype(bf16), w2.astype(bf16),
                            preferred_element_type=jnp.float32) + b2, 0.0)
    h = jnp.maximum(jnp.dot(h.astype(bf16), w3.astype(bf16),
                            preferred_element_type=jnp.float32) + b3, 0.0)
    return jnp.dot(h.astype(bf16), w4.astype(bf16),
                   preferred_element_type=jnp.float32) + b4


# ----------------------------- self-test -----------------------------------

if __name__ == "__main__":
    key = jax.random.PRNGKey(0)
    kp, kx1, kx2, kx3 = jax.random.split(key, 4)
    params = init_params(kp)
    qnet = QNetworkPallas(params)

    # B=1   : DQN act path (single tile, manual DMA overlap)
    # B=100 : padding path, still single tile
    # B=300 : multi-tile BlockSpec-pipelined path (2 tiles at tb=256, 3 at 128)
    for kx, batch in ((kx1, 1), (kx2, 100), (kx3, 300)):
        x = jax.random.normal(kx, (batch, STATE_SIZE), jnp.float32)
        out = jax.block_until_ready(qnet(x))
        assert out.shape == (batch, ACTION_SIZE)

        ref_m = qnetwork_ref_matched(x, params)
        ref_f = qnetwork_ref_f32(x, params)
        scale = float(jnp.max(jnp.abs(ref_m))) + 1e-6
        err_m = float(jnp.max(jnp.abs(out - ref_m)))
        assert err_m <= 5e-3 * max(scale, 1.0), \
            f"B={batch}: mismatch vs matched reference (err={err_m})"
        assert jnp.allclose(out, ref_f, atol=7e-2, rtol=7e-2), \
            f"B={batch}: mismatch vs f32 reference beyond bf16 tolerance"

    # Large-magnitude (unnormalized HIV-state-like) inputs: layer 1 stays f32,
    # so the kernel still tracks the matched reference at 1e5-scale features.
    x_big = jax.random.normal(kx1, (16, STATE_SIZE), jnp.float32) * 1e5
    out_big = jax.block_until_ready(qnet(x_big))
    ref_big = qnetwork_ref_matched(x_big, params)
    scale = float(jnp.max(jnp.abs(ref_big))) + 1e-6
    err_big = float(jnp.max(jnp.abs(out_big - ref_big)))
    assert err_big <= 1e-2 * scale, \
        f"large-magnitude mismatch vs matched reference (err={err_big})"

    print("KERNEL_OK")
</pallas_src>

<mosaic_0001>
module attributes {stable_mosaic.version = 11 : i64} {
  func.func @_mlp_kernel_single(%arg0: i32, %arg1: memref<8x8xf32, #tpu.memory_space<vmem>>, %arg2: memref<8x512xf32, #tpu.memory_space<vmem>>, %arg3: memref<1x512xf32, #tpu.memory_space<vmem>>, %arg4: memref<512x512xbf16, #tpu.memory_space<any>>, %arg5: memref<1x512xf32, #tpu.memory_space<vmem>>, %arg6: memref<512x512xbf16, #tpu.memory_space<any>>, %arg7: memref<1x512xf32, #tpu.memory_space<vmem>>, %arg8: memref<512x128xbf16, #tpu.memory_space<any>>, %arg9: memref<1x128xf32, #tpu.memory_space<vmem>>, %arg10: memref<8x128xf32, #tpu.memory_space<vmem>>, %arg11: memref<512x512xbf16, #tpu.memory_space<vmem>>, %arg12: memref<512x512xbf16, #tpu.memory_space<vmem>>, %arg13: memref<512x128xbf16, #tpu.memory_space<vmem>>, %arg14: memref<3x!tpu.dma_semaphore, #tpu.memory_space<semaphore_mem>>) attributes {dimension_semantics = [#tpu.dimension_semantics<arbitrary>], iteration_bounds = array<i64: 1>, scalar_prefetch = 0 : i64, scratch_operands = 4 : i64, tpu.core_type = #tpu.core_type<tc>, window_params = [{pipeline_mode = #tpu.pipeline_mode<synchronous>, transform_indices = @transform_0, window_bounds = array<i64: 8, 8>}, {pipeline_mode = #tpu.pipeline_mode<synchronous>, transform_indices = @transform_1, window_bounds = array<i64: 8, 512>}, {pipeline_mode = #tpu.pipeline_mode<synchronous>, transform_indices = @transform_2, window_bounds = array<i64: 1, 512>}, {}, {pipeline_mode = #tpu.pipeline_mode<synchronous>, transform_indices = @transform_4, window_bounds = array<i64: 1, 512>}, {}, {pipeline_mode = #tpu.pipeline_mode<synchronous>, transform_indices = @transform_6, window_bounds = array<i64: 1, 512>}, {}, {pipeline_mode = #tpu.pipeline_mode<synchronous>, transform_indices = @transform_8, window_bounds = array<i64: 1, 128>}, {pipeline_mode = #tpu.pipeline_mode<synchronous>, transform_indices = @transform_9, window_bounds = array<i64: 8, 128>}]} {
    %c0_i32 = arith.constant 0 : i32
    %0 = tpu.memref_slice %arg14[%c0_i32] : memref<3x!tpu.dma_semaphore, #tpu.memory_space<semaphore_mem>> -> memref<1x!tpu.dma_semaphore, #tpu.memory_space<semaphore_mem>>
    %1 = tpu.memref_squeeze %0 : memref<1x!tpu.dma_semaphore, #tpu.memory_space<semaphore_mem>> -> memref<!tpu.dma_semaphore, #tpu.memory_space<semaphore_mem>>
    tpu.enqueue_dma source(%arg4 : memref<512x512xbf16, #tpu.memory_space<any>>) target(%arg11 : memref<512x512xbf16, #tpu.memory_space<vmem>>) target_semaphore(%1 : memref<!tpu.dma_semaphore, #tpu.memory_space<semaphore_mem>>)
    %c1_i32 = arith.constant 1 : i32
    %2 = tpu.memref_slice %arg14[%c1_i32] : memref<3x!tpu.dma_semaphore, #tpu.memory_space<semaphore_mem>> -> memref<1x!tpu.dma_semaphore, #tpu.memory_space<semaphore_mem>>
    %3 = tpu.memref_squeeze %2 : memref<1x!tpu.dma_semaphore, #tpu.memory_space<semaphore_mem>> -> memref<!tpu.dma_semaphore, #tpu.memory_space<semaphore_mem>>
    tpu.enqueue_dma source(%arg6 : memref<512x512xbf16, #tpu.memory_space<any>>) target(%arg12 : memref<512x512xbf16, #tpu.memory_space<vmem>>) target_semaphore(%3 : memref<!tpu.dma_semaphore, #tpu.memory_space<semaphore_mem>>)
    %c2_i32 = arith.constant 2 : i32
    %4 = tpu.memref_slice %arg14[%c2_i32] : memref<3x!tpu.dma_semaphore, #tpu.memory_space<semaphore_mem>> -> memref<1x!tpu.dma_semaphore, #tpu.memory_space<semaphore_mem>>
    %5 = tpu.memref_squeeze %4 : memref<1x!tpu.dma_semaphore, #tpu.memory_space<semaphore_mem>> -> memref<!tpu.dma_semaphore, #tpu.memory_space<semaphore_mem>>
    tpu.enqueue_dma source(%arg8 : memref<512x128xbf16, #tpu.memory_space<any>>) target(%arg13 : memref<512x128xbf16, #tpu.memory_space<vmem>>) target_semaphore(%5 : memref<!tpu.dma_semaphore, #tpu.memory_space<semaphore_mem>>)
    %c0 = arith.constant 0 : index
    %c0_0 = arith.constant 0 : index
    %6 = vector.load %arg1[%c0, %c0_0] : memref<8x8xf32, #tpu.memory_space<vmem>>, vector<8x8xf32>
    %c0_1 = arith.constant 0 : index
    %c0_2 = arith.constant 0 : index
    %7 = vector.load %arg2[%c0_1, %c0_2] : memref<8x512xf32, #tpu.memory_space<vmem>>, vector<8x512xf32>
    %cst = arith.constant dense<0.000000e+00> : vector<8x512xf32>
    %8 = tpu.matmul %6, %7, %cst {dimension_numbers = #tpu.dot_dimension_numbers<[1], [0], [0], [1], [0, 0, 1, 1], [], []>} : vector<8x8xf32>, vector<8x512xf32>, vector<8x512xf32> -> vector<8x512xf32>
    %c0_3 = arith.constant 0 : index
    %c0_4 = arith.constant 0 : index
    %9 = vector.load %arg3[%c0_3, %c0_4] : memref<1x512xf32, #tpu.memory_space<vmem>>, vector<1x512xf32>
    %10 = vector.broadcast %9 : vector<1x512xf32> to vector<8x512xf32>
    %11 = arith.addf %8, %10 : vector<8x512xf32>
    %cst_5 = arith.constant 0.000000e+00 : f32
    %12 = vector.broadcast %cst_5 : f32 to vector<8x512xf32>
    %13 = arith.maximumf %11, %12 : vector<8x512xf32>
    %c0_i32_6 = arith.constant 0 : i32
    %14 = tpu.memref_slice %arg14[%c0_i32_6] : memref<3x!tpu.dma_semaphore, #tpu.memory_space<semaphore_mem>> -> memref<1x!tpu.dma_semaphore, #tpu.memory_space<semaphore_mem>>
    %15 = tpu.memref_squeeze %14 : memref<1x!tpu.dma_semaphore, #tpu.memory_space<semaphore_mem>> -> memref<!tpu.dma_semaphore, #tpu.memory_space<semaphore_mem>>
    tpu.wait_dma2 semaphore(%15 : memref<!tpu.dma_semaphore, #tpu.memory_space<semaphore_mem>>) src(%arg4 : memref<512x512xbf16, #tpu.memory_space<any>>) dst(%arg11 : memref<512x512xbf16, #tpu.memory_space<vmem>>)
    %16 = arith.truncf %13 : vector<8x512xf32> to vector<8x512xbf16>
    %c0_7 = arith.constant 0 : index
    %c0_8 = arith.constant 0 : index
    %17 = vector.load %arg11[%c0_7, %c0_8] : memref<512x512xbf16, #tpu.memory_space<vmem>>, vector<512x512xbf16>
    %cst_9 = arith.constant dense<0.000000e+00> : vector<8x512xf32>
    %18 = tpu.matmul %16, %17, %cst_9 {dimension_numbers = #tpu.dot_dimension_numbers<[1], [0], [0], [1], [0, 0, 1, 1], [], []>} : vector<8x512xbf16>, vector<512x512xbf16>, vector<8x512xf32> -> vector<8x512xf32>
    %c0_10 = arith.constant 0 : index
    %c0_11 = arith.constant 0 : index
    %19 = vector.load %arg5[%c0_10, %c0_11] : memref<1x512xf32, #tpu.memory_space<vmem>>, vector<1x512xf32>
    %20 = vector.broadcast %19 : vector<1x512xf32> to vector<8x512xf32>
    %21 = arith.addf %18, %20 : vector<8x512xf32>
    %cst_12 = arith.constant 0.000000e+00 : f32
    %22 = vector.broadcast %cst_12 : f32 to vector<8x512xf32>
    %23 = arith.maximumf %21, %22 : vector<8x512xf32>
    %c1_i32_13 = arith.constant 1 : i32
    %24 = tpu.memref_slice %arg14[%c1_i32_13] : memref<3x!tpu.dma_semaphore, #tpu.memory_space<semaphore_mem>> -> memref<1x!tpu.dma_semaphore, #tpu.memory_space<semaphore_mem>>
    %25 = tpu.memref_squeeze %24 : memref<1x!tpu.dma_semaphore, #tpu.memory_space<semaphore_mem>> -> memref<!tpu.dma_semaphore, #tpu.memory_space<semaphore_mem>>
    tpu.wait_dma2 semaphore(%25 : memref<!tpu.dma_semaphore, #tpu.memory_space<semaphore_mem>>) src(%arg6 : memref<512x512xbf16, #tpu.memory_space<any>>) dst(%arg12 : memref<512x512xbf16, #tpu.memory_space<vmem>>)
    %26 = arith.truncf %23 : vector<8x512xf32> to vector<8x512xbf16>
    %c0_14 = arith.constant 0 : index
    %c0_15 = arith.constant 0 : index
    %27 = vector.load %arg12[%c0_14, %c0_15] : memref<512x512xbf16, #tpu.memory_space<vmem>>, vector<512x512xbf16>
    %cst_16 = arith.constant dense<0.000000e+00> : vector<8x512xf32>
    %28 = tpu.matmul %26, %27, %cst_16 {dimension_numbers = #tpu.dot_dimension_numbers<[1], [0], [0], [1], [0, 0, 1, 1], [], []>} : vector<8x512xbf16>, vector<512x512xbf16>, vector<8x512xf32> -> vector<8x512xf32>
    %c0_17 = arith.constant 0 : index
    %c0_18 = arith.constant 0 : index
    %29 = vector.load %arg7[%c0_17, %c0_18] : memref<1x512xf32, #tpu.memory_space<vmem>>, vector<1x512xf32>
    %30 = vector.broadcast %29 : vector<1x512xf32> to vector<8x512xf32>
    %31 = arith.addf %28, %30 : vector<8x512xf32>
    %cst_19 = arith.constant 0.000000e+00 : f32
    %32 = vector.broadcast %cst_19 : f32 to vector<8x512xf32>
    %33 = arith.maximumf %31, %32 : vector<8x512xf32>
    %c2_i32_20 = arith.constant 2 : i32
    %34 = tpu.memref_slice %arg14[%c2_i32_20] : memref<3x!tpu.dma_semaphore, #tpu.memory_space<semaphore_mem>> -> memref<1x!tpu.dma_semaphore, #tpu.memory_space<semaphore_mem>>
    %35 = tpu.memref_squeeze %34 : memref<1x!tpu.dma_semaphore, #tpu.memory_space<semaphore_mem>> -> memref<!tpu.dma_semaphore, #tpu.memory_space<semaphore_mem>>
    tpu.wait_dma2 semaphore(%35 : memref<!tpu.dma_semaphore, #tpu.memory_space<semaphore_mem>>) src(%arg8 : memref<512x128xbf16, #tpu.memory_space<any>>) dst(%arg13 : memref<512x128xbf16, #tpu.memory_space<vmem>>)
    %36 = arith.truncf %33 : vector<8x512xf32> to vector<8x512xbf16>
    %c0_21 = arith.constant 0 : index
    %c0_22 = arith.constant 0 : index
    %37 = vector.load %arg13[%c0_21, %c0_22] : memref<512x128xbf16, #tpu.memory_space<vmem>>, vector<512x128xbf16>
    %cst_23 = arith.constant dense<0.000000e+00> : vector<8x128xf32>
    %38 = tpu.matmul %36, %37, %cst_23 {dimension_numbers = #tpu.dot_dimension_numbers<[1], [0], [0], [1], [0, 0, 1, 1], [], []>} : vector<8x512xbf16>, vector<512x128xbf16>, vector<8x128xf32> -> vector<8x128xf32>
    %c0_24 = arith.constant 0 : index
    %c0_25 = arith.constant 0 : index
    %39 = vector.load %arg9[%c0_24, %c0_25] : memref<1x128xf32, #tpu.memory_space<vmem>>, vector<1x128xf32>
    %40 = vector.broadcast %39 : vector<1x128xf32> to vector<8x128xf32>
    %41 = arith.addf %38, %40 : vector<8x128xf32>
    %c0_26 = arith.constant 0 : index
    %c0_27 = arith.constant 0 : index
    %42 = vector.load %arg10[%c0_26, %c0_27] : memref<8x128xf32, #tpu.memory_space<vmem>>, vector<8x128xf32>
    tpu.vector_store %arg10[%c0_26, %c0_27], %41 {strides = array<i32>} : memref<8x128xf32, #tpu.memory_space<vmem>>, vector<8x128xf32>,
    return
  }
  func.func @transform_0(%arg0: i32) -> (i32, i32) {
    %c0_i32 = arith.constant 0 : i32
    %c0_i32_0 = arith.constant 0 : i32
    %c0_i32_1 = arith.constant 0 : i32
    return %c0_i32, %c0_i32_0 : i32, i32
  }
  func.func @transform_1(%arg0: i32) -> (i32, i32) {
    %c0_i32 = arith.constant 0 : i32
    %c0_i32_0 = arith.constant 0 : i32
    %c0_i32_1 = arith.constant 0 : i32
    return %c0_i32, %c0_i32_0 : i32, i32
  }
  func.func @transform_2(%arg0: i32) -> (i32, i32) {
    %c0_i32 = arith.constant 0 : i32
    %c0_i32_0 = arith.constant 0 : i32
    %c0_i32_1 = arith.constant 0 : i32
    return %c0_i32, %c0_i32_0 : i32, i32
  }
  func.func @transform_4(%arg0: i32) -> (i32, i32) {
    %c0_i32 = arith.constant 0 : i32
    %c0_i32_0 = arith.constant 0 : i32
    %c0_i32_1 = arith.constant 0 : i32
    return %c0_i32, %c0_i32_0 : i32, i32
  }
  func.func @transform_6(%arg0: i32) -> (i32, i32) {
    %c0_i32 = arith.constant 0 : i32
    %c0_i32_0 = arith.constant 0 : i32
    %c0_i32_1 = arith.constant 0 : i32
    return %c0_i32, %c0_i32_0 : i32, i32
  }
  func.func @transform_8(%arg0: i32) -> (i32, i32) {
    %c0_i32 = arith.constant 0 : i32
    %c0_i32_0 = arith.constant 0 : i32
    %c0_i32_1 = arith.constant 0 : i32
    return %c0_i32, %c0_i32_0 : i32, i32
  }
  func.func @transform_9(%arg0: i32) -> (i32, i32) {
    %c0_i32 = arith.constant 0 : i32
    %c0_i32_0 = arith.constant 0 : i32
    %c0_i32_1 = arith.constant 0 : i32
    return %c0_i32, %c0_i32_0 : i32, i32
  }
}

</mosaic_0001>

<bundles_post_ra>
// kernel: _forward_padded.1
= control target key start
LH: loop header
LB: loop body
LE: loop exit
PB: predicated region body
PF: predicated region fallthrough
CT: control target
= control target key end

     0   :  { %14 = vsyncpa [#allocation7], 0  ;;  %s4079_s12 = smov [#allocation6]   ;;  %s4283_s0 = inlined_call_operand.vmem [shape: f32[8,8], index: 0, kind: input, shape index: {}]   ;;  %s4284_s1 = inlined_call_operand.hbm [shape: f32[8,512], index: 1, kind: input, shape index: {}]   ;;  %s4285_s2 = inlined_call_operand.vmem [shape: f32[1,512], index: 2, kind: input, shape index: {}]   ;;  %s4286_s3 = inlined_call_operand.hbm [shape: bf16[512,512], index: 3, kind: input, shape index: {}]   ;;  %s4287_s4 = inlined_call_operand.vmem [shape: f32[1,512], index: 4, kind: input, shape index: {}]   ;;  %s4288_s5 = inlined_call_operand.hbm [shape: bf16[512,512], index: 5, kind: input, shape index: {}]   ;;  %s4289_s6 = inlined_call_operand.vmem [shape: f32[1,512], index: 6, kind: input, shape index: {}]   ;;  %s4290_s7 = inlined_call_operand.hbm [shape: bf16[512,128], index: 7, kind: input, shape index: {}]   ;;  %s4291_s8 = inlined_call_operand.vmem [shape: f32[1,128], index: 8, kind: input, shape index: {}]   ;;  %s4292_s9 = inlined_call_operand.vmem [shape: f32[8,128], index: 9, kind: output, shape index: {}]  }
   0x1   :  { %s22_s11 = sshll.u32 %s4284_s1, 4  ;;  %s24_s13 = sshll.u32 %s4079_s12, 4  ;;  %s23_s11 = int_to_ptr.hbm [resolvable:$true] %s22_s11  ;;  %s25_s13 = int_to_ptr.vmem [resolvable:$true] %s24_s13 }
   0x2   :  { %27 = dma.hbm_to_vmem [thread:$0]  %s23_s11, 512, %s25_s13, [#allocation7]  }
   0x3   :  { %4071 = dma.done.wait [#allocation7], 512  }
   0x4   :  { %4072 = vsyncadd [#allocation7], 4294966784  ;;  %vm96_vm0 = vcmask 64512   ;;  %v84_v0 = vld [vmem:[#allocation6 + $0x10] sm:$0xff]  ;;  %v85_v1 = vld [vmem:[#allocation6 + $0x18] sm:$0xff]  ;;  %s47_s17 = sshll.u32 %s4286_s3, 4  ;;  %s48_s17 = int_to_ptr.hbm [resolvable:$true] %s47_s17 }
   0x5   :  { %v81_v2 = vld [vmem:[%s4283_s0] sm:$0xff]  ;;  %155 = vmatpush.msra.mxu2 %v84_v0  ;;  %175 = vmatpush.msra.mxu3 %v85_v1  ;;  %v83_v4 = vld [vmem:[#allocation6 + $0x8] sm:$0xff]  ;;  %s4080_s18 = smov [#allocation2]   ;;  %s61_s21 = sshll.u32 %s4288_s5, 4  ;;  %s62_s21 = int_to_ptr.hbm [resolvable:$true] %s61_s21 }
   0x6   :  { %v82_v3 = vld [vmem:[#allocation6] sm:$0xff]  ;;  %2525 = vmatmul.msk.f32.vlgmr.msra.gmra.mxu2 %vm96_vm0, %v81_v2  ;;  %2526 = vmatmul.msk.f32.vlgmr.msra.gmra.mxu3 %vm96_vm0, %v81_v2  ;;  %s49_s19 = sshll.u32 %s4080_s18, 4  ;;  %s4081_s22 = smov [#allocation3]   ;;  %s50_s19 = int_to_ptr.vmem [resolvable:$true] %s49_s19 }
   0x7   :  { %115 = vmatpush.msra.mxu0 %v82_v3  ;;  %135 = vmatpush.msra.mxu1 %v83_v4  ;;  %52 = dma.hbm_to_vmem [thread:$0]  %s48_s17, 16384, %s50_s19, [#allocation5]  ;;  %v86_v5 = vld [vmem:[%s4285_s2] sm:$0xf] }
   0x8   :  { %2523 = vmatmul.msk.f32.vlgmr.msra.gmra.mxu0 %vm96_vm0, %v81_v2  ;;  %2524 = vmatmul.msk.f32.vlgmr.msra.gmra.mxu1 %vm96_vm0, %v81_v2  ;;  %s63_s23 = sshll.u32 %s4081_s22, 4  ;;  %s75_s26 = sshll.u32 %s4290_s7, 4  ;;  %v88_v6 = vperm.slane %v86_v5, 0  ;;  %v89_v7 = vperm.slane %v86_v5, 1  ;;  %v90_v12 = vperm.slane %v86_v5, 2  ;;  %v91_v13 = vperm.slane %v86_v5, 3  ;;  %s64_s23 = int_to_ptr.vmem [resolvable:$true] %s63_s23  ;;  %s76_s26 = int_to_ptr.hbm [resolvable:$true] %s75_s26 }
   0x9   :  { %66 = dma.hbm_to_vmem [thread:$0]  %s62_s21, 16384, %s64_s23, [#allocation5 + $0x1] }
   0xa   :  { %s4082_s3 = smov [#allocation4]  }
   0xb   :  { %s77_s27 = sshll.u32 %s4082_s3, 4  ;;  %s78_s27 = int_to_ptr.vmem [resolvable:$true] %s77_s27 }
   0xc   :  { %80 = dma.hbm_to_vmem [thread:$0]  %s76_s26, 4096, %s78_s27, [#allocation5 + $0x2] }
  0x85   :  { %v117_v8 = vpop.f32.mrf.mxu0  ;;  %v137_v9 = vpop.f32.mrf.mxu1 }
  0x86   :  { %v4151_v10 = vadd.f32 %v117_v8, %v88_v6  ;;  %v4153_v11 = vadd.f32 %v137_v9, %v89_v7 }
  0x88   :  { %v180_v14 = vmax.f32 %v4151_v10, 0.0  ;;  %v181_v15 = vmax.f32 %v4153_v11, 0.0 }
  0x89   :  { %v157_v16 = vpop.f32.mrf.mxu2  ;;  %v177_v17 = vpop.f32.mrf.mxu3 }
  0x8a   :  { %v4157_v18 = vadd.f32 %v157_v16, %v90_v12  ;;  %v4159_v19 = vadd.f32 %v177_v17, %v91_v13 }
  0x8c   :  { %v182_v20 = vmax.f32 %v4157_v18, 0.0  ;;  %v183_v21 = vmax.f32 %v4159_v19, 0.0 }
  0x8d   :  { %4073 = dma.done.wait [#allocation5], 16384 }
  0x8e   :  { %4074 = vsyncadd [#allocation5], 4294950912  ;;  %v2641_v22 = vld [vmem:[#allocation2 + $0xe0] sm:$0xf]  ;;  %v3712_v23 = vld [vmem:[#allocation2 + $0xec] sm:$0xf0] }
  0x8f   :  { %v2769_v24 = vld [vmem:[#allocation2 + $0x1e0] sm:$0xf]  ;;  %v2642_v25 = vor.u32 %v3712_v23, %v2641_v22  ;;  %v3744_v26 = vld [vmem:[#allocation2 + $0x1ec] sm:$0xf0] }
  0x90   :  { %v2897_v27 = vld [vmem:[#allocation2 + $0x2e0] sm:$0xf]  ;;  %v3776_v28 = vld [vmem:[#allocation2 + $0x2ec] sm:$0xf0]  ;;  %v2770_v29 = vor.u32 %v3744_v26, %v2769_v24 }
  0x91   :  { %v2898_v30 = vor.u32 %v3776_v28, %v2897_v27  ;;  %v3025_v31 = vld [vmem:[#allocation2 + $0x3e0] sm:$0xf]  ;;  %v3808_v32 = vld [vmem:[#allocation2 + $0x3ec] sm:$0xf0]  ;;  %970 = vmatpush.bf16.msrb.mxu0 %v2642_v25 }
  0x92   :  { %v2625_v33 = vld [vmem:[#allocation2 + $0xc0] sm:$0xf]  ;;  %v3026_v34 = vor.u32 %v3808_v32, %v3025_v31  ;;  %v3708_v35 = vld [vmem:[#allocation2 + $0xcc] sm:$0xf0]  ;;  %983 = vmatpush.bf16.msrb.mxu1 %v2770_v29 }
  0x93   :  { %v2753_v36 = vld [vmem:[#allocation2 + $0x1c0] sm:$0xf]  ;;  %v3740_v37 = vld [vmem:[#allocation2 + $0x1cc] sm:$0xf0]  ;;  %996 = vmatpush.bf16.msrb.mxu2 %v2898_v30  ;;  %v2626_v38 = vor.u32 %v3708_v35, %v2625_v33 }
  0x94   :  { %v2754_v39 = vor.u32 %v3740_v37, %v2753_v36  ;;  %v2881_v40 = vld [vmem:[#allocation2 + $0x2c0] sm:$0xf]  ;;  %v3772_v41 = vld [vmem:[#allocation2 + $0x2cc] sm:$0xf0]  ;;  %1009 = vmatpush.bf16.msrb.mxu3 %v3026_v34 }
  0x95   :  { %v3009_v42 = vld [vmem:[#allocation2 + $0x3c0] sm:$0xf]  ;;  %v2882_v43 = vor.u32 %v3772_v41, %v2881_v40  ;;  %v3804_v44 = vld [vmem:[#allocation2 + $0x3cc] sm:$0xf0]  ;;  %971 = vmatpush.bf16.msrb.mxu0 %v2626_v38 }
  0x96   :  { %v2609_v45 = vld [vmem:[#allocation2 + $0xa0] sm:$0xf]  ;;  %v3704_v46 = vld [vmem:[#allocation2 + $0xac] sm:$0xf0]  ;;  %v3010_v47 = vor.u32 %v3804_v44, %v3009_v42  ;;  %984 = vmatpush.bf16.msrb.mxu1 %v2754_v39 }
  0x97   :  { %v2737_v48 = vld [vmem:[#allocation2 + $0x1a0] sm:$0xf]  ;;  %v3736_v49 = vld [vmem:[#allocation2 + $0x1ac] sm:$0xf0]  ;;  %v2610_v51 = vor.u32 %v3704_v46, %v2609_v45  ;;  %997 = vmatpush.bf16.msrb.mxu2 %v2882_v43 }
  0x98   :  { %v2865_v50 = vld [vmem:[#allocation2 + $0x2a0] sm:$0xf]  ;;  %v3768_v52 = vld [vmem:[#allocation2 + $0x2ac] sm:$0xf0]  ;;  %v2738_v55 = vor.u32 %v3736_v49, %v2737_v48  ;;  %1010 = vmatpush.bf16.msrb.mxu3 %v3010_v47 }
  0x99   :  { %v2993_v53 = vld [vmem:[#allocation2 + $0x3a0] sm:$0xf]  ;;  %v3800_v54 = vld [vmem:[#allocation2 + $0x3ac] sm:$0xf0]  ;;  %v2866_v56 = vor.u32 %v3768_v52, %v2865_v50  ;;  %972 = vmatpush.bf16.msrb.mxu0 %v2610_v51 }
  0x9a   :  { %v2593_v57 = vld [vmem:[#allocation2 + $0x80] sm:$0xf]  ;;  %v3700_v58 = vld [vmem:[#allocation2 + $0x8c] sm:$0xf0]  ;;  %v2994_v60 = vor.u32 %v3800_v54, %v2993_v53  ;;  %985 = vmatpush.bf16.msrb.mxu1 %v2738_v55 }
  0x9b   :  { %v2721_v59 = vld [vmem:[#allocation2 + $0x180] sm:$0xf]  ;;  %v3732_v61 = vld [vmem:[#allocation2 + $0x18c] sm:$0xf0]  ;;  %v2594_v2 = vor.u32 %v3700_v58, %v2593_v57  ;;  %998 = vmatpush.bf16.msrb.mxu2 %v2866_v56  ;;  %v3710_v58 = vld [vmem:[#allocation2 + $0xe4] sm:$0xf] }
  0x9c   :  { %v2849_v62 = vld [vmem:[#allocation2 + $0x280] sm:$0xf]  ;;  %v3764_v63 = vld [vmem:[#allocation2 + $0x28c] sm:$0xf0]  ;;  %v2722_v3 = vor.u32 %v3732_v61, %v2721_v59  ;;  %1011 = vmatpush.bf16.msrb.mxu3 %v2994_v60  ;;  %v2643_v59 = vld [vmem:[#allocation2 + $0xf0] sm:$0xf0] }
  0x9d   :  { %v2977_v0 = vld [vmem:[#allocation2 + $0x380] sm:$0xf]  ;;  %v3796_v1 = vld [vmem:[#allocation2 + $0x38c] sm:$0xf0]  ;;  %v2850_v4 = vor.u32 %v3764_v63, %v2849_v62  ;;  %973 = vmatpush.bf16.msrb.mxu0 %v2594_v2  ;;  %v3742_v60 = vld [vmem:[#allocation2 + $0x1e4] sm:$0xf] }
  0x9e   :  { %v2577_v5 = vld [vmem:[#allocation2 + $0x60] sm:$0xf]  ;;  %v3696_v6 = vld [vmem:[#allocation2 + $0x6c] sm:$0xf0]  ;;  %v2978_v8 = vor.u32 %v3796_v1, %v2977_v0  ;;  %986 = vmatpush.bf16.msrb.mxu1 %v2722_v3  ;;  %v2771_v62 = vld [vmem:[#allocation2 + $0x1f0] sm:$0xf0] }
  0x9f   :  { %v2705_v7 = vld [vmem:[#allocation2 + $0x160] sm:$0xf]  ;;  %v3728_v9 = vld [vmem:[#allocation2 + $0x16c] sm:$0xf0]  ;;  %v2578_v22 = vor.u32 %v3696_v6, %v2577_v5  ;;  %999 = vmatpush.bf16.msrb.mxu2 %v2850_v4  ;;  %v3774_v63 = vld [vmem:[#allocation2 + $0x2e4] sm:$0xf]  ;;  %v2646_v6 = vor.u32 %v3710_v58, %v2643_v59 }
  0xa0   :  { %v2833_v12 = vld [vmem:[#allocation2 + $0x260] sm:$0xf]  ;;  %v3760_v13 = vld [vmem:[#allocation2 + $0x26c] sm:$0xf0]  ;;  %v2706_v23 = vor.u32 %v3728_v9, %v2705_v7  ;;  %1012 = vmatpush.bf16.msrb.mxu3 %v2978_v8  ;;  %v2899_v0 = vld [vmem:[#allocation2 + $0x2f0] sm:$0xf0]  ;;  %v2774_v7 = vor.u32 %v3742_v60, %v2771_v62 }
  0xa1   :  { %v2961_v16 = vld [vmem:[#allocation2 + $0x360] sm:$0xf]  ;;  %v3792_v17 = vld [vmem:[#allocation2 + $0x36c] sm:$0xf0]  ;;  %v2834_v24 = vor.u32 %v3760_v13, %v2833_v12  ;;  %974 = vmatpush.bf16.msrb.mxu0 %v2578_v22  ;;  %v3806_v3 = vld [vmem:[#allocation2 + $0x3e4] sm:$0xf]  ;;  %v2902_v8 = vor.u32 %v3774_v63, %v2899_v0 }
  0xa2   :  { %v2561_v25 = vld [vmem:[#allocation2 + $0x40] sm:$0xf]  ;;  %v3692_v26 = vld [vmem:[#allocation2 + $0x4c] sm:$0xf0]  ;;  %v2962_v28 = vor.u32 %v3792_v17, %v2961_v16  ;;  %987 = vmatpush.bf16.msrb.mxu1 %v2706_v23  ;;  %v3027_v4 = vld [vmem:[#allocation2 + $0x3f0] sm:$0xf0] }
  0xa3   :  { %v2689_v27 = vld [vmem:[#allocation2 + $0x140] sm:$0xf]  ;;  %v3724_v29 = vld [vmem:[#allocation2 + $0x14c] sm:$0xf0]  ;;  %v2562_v34 = vor.u32 %v3692_v26, %v2561_v25  ;;  %1000 = vmatpush.bf16.msrb.mxu2 %v2834_v24  ;;  %v3706_v9 = vld [vmem:[#allocation2 + $0xc4] sm:$0xf]  ;;  %v3030_v16 = vor.u32 %v3806_v3, %v3027_v4  ;;  %v4166_v24 = vpack.c.bf16 %v182_v20, %v182_v20  ;;  %v4181_v20 = vpack.c.bf16 %v181_v15, %v181_v15 }
  0xa4   :  { %v2817_v30 = vld [vmem:[#allocation2 + $0x240] sm:$0xf]  ;;  %v3756_v31 = vld [vmem:[#allocation2 + $0x24c] sm:$0xf0]  ;;  %v2690_v35 = vor.u32 %v3724_v29, %v2689_v27  ;;  %1013 = vmatpush.bf16.msrb.mxu3 %v2962_v28  ;;  %v2627_v12 = vld [vmem:[#allocation2 + $0xd0] sm:$0xf0]  ;;  %v4171_v27 = vpack.c.bf16 %v183_v21, %v183_v21  ;;  %v4176_v28 = vpack.c.bf16 %v180_v14, %v180_v14 }
  0xa5   :  { %v2945_v32 = vld [vmem:[#allocation2 + $0x340] sm:$0xf]  ;;  %v3788_v33 = vld [vmem:[#allocation2 + $0x34c] sm:$0xf0]  ;;  %v2818_v36 = vor.u32 %v3756_v31, %v2817_v30  ;;  %975 = vmatpush.bf16.msrb.mxu0 %v2562_v34  ;;  %v3738_v13 = vld [vmem:[#allocation2 + $0x1c4] sm:$0xf]  ;;  %v2630_v18 = vor.u32 %v3706_v9, %v2627_v12 }
  0xa6   :  { %v2545_v37 = vld [vmem:[#allocation2 + $0x20] sm:$0xf]  ;;  %v3688_v38 = vld [vmem:[#allocation2 + $0x2c] sm:$0xf0]  ;;  %v2946_v40 = vor.u32 %v3788_v33, %v2945_v32  ;;  %988 = vmatpush.bf16.msrb.mxu1 %v2690_v35  ;;  %v2755_v17 = vld [vmem:[#allocation2 + $0x1d0] sm:$0xf0] }
  0xa7   :  { %v2673_v39 = vld [vmem:[#allocation2 + $0x120] sm:$0xf]  ;;  %v3720_v41 = vld [vmem:[#allocation2 + $0x12c] sm:$0xf0]  ;;  %v2546_v46 = vor.u32 %v3688_v38, %v2545_v37  ;;  %1001 = vmatpush.bf16.msrb.mxu2 %v2818_v36  ;;  %v3770_v22 = vld [vmem:[#allocation2 + $0x2c4] sm:$0xf]  ;;  %v2758_v29 = vor.u32 %v3738_v13, %v2755_v17 }
  0xa8   :  { %v2801_v42 = vld [vmem:[#allocation2 + $0x220] sm:$0xf]  ;;  %v3752_v43 = vld [vmem:[#allocation2 + $0x22c] sm:$0xf0]  ;;  %v2674_v49 = vor.u32 %v3720_v41, %v2673_v39  ;;  %1014 = vmatpush.bf16.msrb.mxu3 %v2946_v40  ;;  %v2883_v23 = vld [vmem:[#allocation2 + $0x2d0] sm:$0xf0] }
  0xa9   :  { %v2929_v44 = vld [vmem:[#allocation2 + $0x320] sm:$0xf]  ;;  %v3784_v45 = vld [vmem:[#allocation2 + $0x32c] sm:$0xf0]  ;;  %v2802_v50 = vor.u32 %v3752_v43, %v2801_v42  ;;  %976 = vmatpush.bf16.msrb.mxu0 %v2546_v46  ;;  %v3802_v25 = vld [vmem:[#allocation2 + $0x3c4] sm:$0xf]  ;;  %v2886_v19 = vor.u32 %v3770_v22, %v2883_v23 }
  0xaa   :  { %v2529_v47 = vld [vmem:[#allocation2] sm:$0xf]  ;;  %v3684_v48 = vld [vmem:[#allocation2 + $0xc] sm:$0xf0]  ;;  %v2930_v54 = vor.u32 %v3784_v45, %v2929_v44  ;;  %989 = vmatpush.bf16.msrb.mxu1 %v2674_v49  ;;  %v3011_v26 = vld [vmem:[#allocation2 + $0x3d0] sm:$0xf0] }
  0xab   :  { %v2657_v51 = vld [vmem:[#allocation2 + $0x100] sm:$0xf]  ;;  %v3716_v52 = vld [vmem:[#allocation2 + $0x10c] sm:$0xf0]  ;;  %v2530_v61 = vor.u32 %v3684_v48, %v2529_v47  ;;  %1002 = vmatpush.bf16.msrb.mxu2 %v2802_v50  ;;  %v3702_v30 = vld [vmem:[#allocation2 + $0xa4] sm:$0xf]  ;;  %v3014_v10 = vor.u32 %v3802_v25, %v3011_v26 }
  0xac   :  { %v2785_v53 = vld [vmem:[#allocation2 + $0x200] sm:$0xf]  ;;  %v3748_v55 = vld [vmem:[#allocation2 + $0x20c] sm:$0xf0]  ;;  %v2658_v1 = vor.u32 %v3716_v52, %v2657_v51  ;;  %1015 = vmatpush.bf16.msrb.mxu3 %v2930_v54  ;;  %v2611_v21 = vld [vmem:[#allocation2 + $0xb0] sm:$0xf0] }
  0xad   :  { %v2913_v56 = vld [vmem:[#allocation2 + $0x300] sm:$0xf]  ;;  %v3780_v57 = vld [vmem:[#allocation2 + $0x30c] sm:$0xf0]  ;;  %v2786_v2 = vor.u32 %v3748_v55, %v2785_v53  ;;  %977 = vmatpush.bf16.msrb.mxu0 %v2530_v61  ;;  %v3734_v31 = vld [vmem:[#allocation2 + $0x1a4] sm:$0xf]  ;;  %v2614_v11 = vor.u32 %v3702_v30, %v2611_v21 }
  0xae   :  { %v2914_v5 = vor.u32 %v3780_v57, %v2913_v56  ;;  %990 = vmatpush.bf16.msrb.mxu1 %v2658_v1  ;;  %v2739_v32 = vld [vmem:[#allocation2 + $0x1b0] sm:$0xf0]  ;;  %v3766_v14 = vld [vmem:[#allocation2 + $0x2a4] sm:$0xf] }
  0xaf   :  { %1003 = vmatpush.bf16.msrb.mxu2 %v2786_v2  ;;  %v2867_v33 = vld [vmem:[#allocation2 + $0x2b0] sm:$0xf0]  ;;  %v3798_v34 = vld [vmem:[#allocation2 + $0x3a4] sm:$0xf]  ;;  %v2742_v15 = vor.u32 %v3734_v31, %v2739_v32 }
  0xb0   :  { %1016 = vmatpush.bf16.msrb.mxu3 %v2914_v5  ;;  %v2995_v35 = vld [vmem:[#allocation2 + $0x3b0] sm:$0xf0]  ;;  %978 = vmatmul.bf16.vlgmr.msrb.gmra.mxu0 %v4176_v28  ;;  %v2870_v36 = vor.u32 %v3766_v14, %v2867_v33  ;;  %v3698_v37 = vld [vmem:[#allocation2 + $0x84] sm:$0xf] }
  0xb1   :  { %1022 = vmatpush.bf16.msra.mxu0 %v2646_v6  ;;  %991 = vmatmul.bf16.vlgmr.msrb.gmra.mxu1 %v4181_v20  ;;  %v2595_v38 = vld [vmem:[#allocation2 + $0x90] sm:$0xf0]  ;;  %v3730_v39 = vld [vmem:[#allocation2 + $0x184] sm:$0xf]  ;;  %v2998_v40 = vor.u32 %v3798_v34, %v2995_v35 }
  0xb2   :  { %1035 = vmatpush.bf16.msra.mxu1 %v2774_v7  ;;  %1004 = vmatmul.bf16.vlgmr.msrb.gmra.mxu2 %v4166_v24  ;;  %v2723_v41 = vld [vmem:[#allocation2 + $0x190] sm:$0xf0]  ;;  %v3762_v42 = vld [vmem:[#allocation2 + $0x284] sm:$0xf]  ;;  %v2598_v46 = vor.u32 %v3698_v37, %v2595_v38  ;;  %v3745_v38 = vld [vmem:[#allocation2 + $0x1f4] sm:$0xf0] }
  0xb3   :  { %1048 = vmatpush.bf16.msra.mxu2 %v2902_v8  ;;  %1017 = vmatmul.bf16.vlgmr.msrb.gmra.mxu3 %v4171_v27  ;;  %v2851_v43 = vld [vmem:[#allocation2 + $0x290] sm:$0xf0]  ;;  %v3794_v44 = vld [vmem:[#allocation2 + $0x384] sm:$0xf]  ;;  %v2726_v47 = vor.u32 %v3730_v39, %v2723_v41  ;;  %v2905_v39 = vld [vmem:[#allocation2 + $0x2e8] sm:$0xf] }
  0xb4   :  { %1061 = vmatpush.bf16.msra.mxu3 %v3030_v16  ;;  %v2979_v45 = vld [vmem:[#allocation2 + $0x390] sm:$0xf0]  ;;  %v2854_v48 = vor.u32 %v3762_v42, %v2851_v43  ;;  %v3694_v49 = vld [vmem:[#allocation2 + $0x64] sm:$0xf]  ;;  %v3033_v43 = vld [vmem:[#allocation2 + $0x3e8] sm:$0xf] }
  0xb5   :  { %1023 = vmatpush.bf16.msra.mxu0 %v2630_v18  ;;  %v2579_v50 = vld [vmem:[#allocation2 + $0x70] sm:$0xf0]  ;;  %v3726_v51 = vld [vmem:[#allocation2 + $0x164] sm:$0xf]  ;;  %v2982_v52 = vor.u32 %v3794_v44, %v2979_v45  ;;  %v3809_v44 = vld [vmem:[#allocation2 + $0x3f4] sm:$0xf0] }
  0xb6   :  { %1036 = vmatpush.bf16.msra.mxu1 %v2758_v29  ;;  %v2707_v53 = vld [vmem:[#allocation2 + $0x170] sm:$0xf0]  ;;  %v3758_v54 = vld [vmem:[#allocation2 + $0x264] sm:$0xf]  ;;  %v2582_v58 = vor.u32 %v3694_v49, %v2579_v50  ;;  %v2633_v49 = vld [vmem:[#allocation2 + $0xc8] sm:$0xf] }
  0xb7   :  { %1049 = vmatpush.bf16.msra.mxu2 %v2886_v19  ;;  %v2835_v55 = vld [vmem:[#allocation2 + $0x270] sm:$0xf0]  ;;  %v3790_v56 = vld [vmem:[#allocation2 + $0x364] sm:$0xf]  ;;  %v2710_v59 = vor.u32 %v3726_v51, %v2707_v53  ;;  %v3709_v50 = vld [vmem:[#allocation2 + $0xd4] sm:$0xf0] }
  0xb8   :  { %1062 = vmatpush.bf16.msra.mxu3 %v3014_v10  ;;  %v2963_v57 = vld [vmem:[#allocation2 + $0x370] sm:$0xf0]  ;;  %v2838_v60 = vor.u32 %v3758_v54, %v2835_v55  ;;  %v3690_v61 = vld [vmem:[#allocation2 + $0x44] sm:$0xf]  ;;  %v2761_v51 = vld [vmem:[#allocation2 + $0x1c8] sm:$0xf] }
  0xb9   :  { %1024 = vmatpush.bf16.msra.mxu0 %v2614_v11  ;;  %v2563_v62 = vld [vmem:[#allocation2 + $0x50] sm:$0xf0]  ;;  %v3722_v63 = vld [vmem:[#allocation2 + $0x144] sm:$0xf]  ;;  %v2966_v0 = vor.u32 %v3790_v56, %v2963_v57  ;;  %v2649_v11 = vld [vmem:[#allocation2 + $0xe8] sm:$0xf] }
  0xba   :  { %1037 = vmatpush.bf16.msra.mxu1 %v2742_v15  ;;  %v2691_v1 = vld [vmem:[#allocation2 + $0x150] sm:$0xf0]  ;;  %v3754_v2 = vld [vmem:[#allocation2 + $0x244] sm:$0xf]  ;;  %v2566_v6 = vor.u32 %v3690_v61, %v2563_v62  ;;  %v3713_v15 = vld [vmem:[#allocation2 + $0xf4] sm:$0xf0] }
  0xbb   :  { %1050 = vmatpush.bf16.msra.mxu2 %v2870_v36  ;;  %v2819_v3 = vld [vmem:[#allocation2 + $0x250] sm:$0xf0]  ;;  %v3786_v4 = vld [vmem:[#allocation2 + $0x344] sm:$0xf]  ;;  %v2694_v7 = vor.u32 %v3722_v63, %v2691_v1  ;;  %v2777_v36 = vld [vmem:[#allocation2 + $0x1e8] sm:$0xf] }
  0xbc   :  { %1063 = vmatpush.bf16.msra.mxu3 %v2998_v40  ;;  %v2947_v5 = vld [vmem:[#allocation2 + $0x350] sm:$0xf0]  ;;  %v2822_v8 = vor.u32 %v3754_v2, %v2819_v3  ;;  %v3686_v9 = vld [vmem:[#allocation2 + $0x24] sm:$0xf]  ;;  %v3777_v40 = vld [vmem:[#allocation2 + $0x2f4] sm:$0xf0] }
  0xbd   :  { %1025 = vmatpush.bf16.msra.mxu0 %v2598_v46  ;;  %v2547_v12 = vld [vmem:[#allocation2 + $0x30] sm:$0xf0]  ;;  %v3718_v13 = vld [vmem:[#allocation2 + $0x124] sm:$0xf]  ;;  %v2950_v16 = vor.u32 %v3786_v4, %v2947_v5  ;;  %v2650_v46 = vor.u32 %v3713_v15, %v2649_v11  ;;  %v3741_v53 = vld [vmem:[#allocation2 + $0x1d4] sm:$0xf0] }
  0xbe   :  { %1038 = vmatpush.bf16.msra.mxu1 %v2726_v47  ;;  %v2675_v17 = vld [vmem:[#allocation2 + $0x130] sm:$0xf0]  ;;  %v3750_v22 = vld [vmem:[#allocation2 + $0x224] sm:$0xf]  ;;  %v2550_v18 = vor.u32 %v3686_v9, %v2547_v12  ;;  %v2778_v47 = vor.u32 %v3745_v38, %v2777_v36  ;;  %v2889_v54 = vld [vmem:[#allocation2 + $0x2c8] sm:$0xf] }
  0xbf   :  { %1051 = vmatpush.bf16.msra.mxu2 %v2854_v48  ;;  %v2803_v23 = vld [vmem:[#allocation2 + $0x230] sm:$0xf0]  ;;  %v3782_v25 = vld [vmem:[#allocation2 + $0x324] sm:$0xf]  ;;  %v2678_v30 = vor.u32 %v3718_v13, %v2675_v17  ;;  %v2906_v48 = vor.u32 %v3777_v40, %v2905_v39  ;;  %v3773_v55 = vld [vmem:[#allocation2 + $0x2d4] sm:$0xf0] }
  0xc0   :  { %1064 = vmatpush.bf16.msra.mxu3 %v2982_v52  ;;  %v2931_v26 = vld [vmem:[#allocation2 + $0x330] sm:$0xf0]  ;;  %v3682_v29 = vld [vmem:[#allocation2 + $0x4] sm:$0xf]  ;;  %v2806_v21 = vor.u32 %v3750_v22, %v2803_v23  ;;  %v3034_v52 = vor.u32 %v3809_v44, %v3033_v43  ;;  %v3017_v56 = vld [vmem:[#allocation2 + $0x3c8] sm:$0xf] }
  0xc1   :  { %1026 = vmatpush.bf16.msra.mxu0 %v2582_v58  ;;  %v2531_v19 = vld [vmem:[#allocation2 + $0x10] sm:$0xf0]  ;;  %v3714_v31 = vld [vmem:[#allocation2 + $0x104] sm:$0xf]  ;;  %v2934_v14 = vor.u32 %v3782_v25, %v2931_v26  ;;  %v3805_v57 = vld [vmem:[#allocation2 + $0x3d4] sm:$0xf0]  ;;  %v2634_v58 = vor.u32 %v3709_v50, %v2633_v49 }
  0xc2   :  { %1039 = vmatpush.bf16.msra.mxu1 %v2710_v59  ;;  %v2659_v10 = vld [vmem:[#allocation2 + $0x110] sm:$0xf0]  ;;  %v3746_v32 = vld [vmem:[#allocation2 + $0x204] sm:$0xf]  ;;  %v2534_v37 = vor.u32 %v3682_v29, %v2531_v19  ;;  %v2762_v59 = vor.u32 %v3741_v53, %v2761_v51  ;;  %v2617_v61 = vld [vmem:[#allocation2 + $0xa8] sm:$0xf] }
  0xc3   :  { %1052 = vmatpush.bf16.msra.mxu2 %v2838_v60  ;;  %v2787_v33 = vld [vmem:[#allocation2 + $0x210] sm:$0xf0]  ;;  %v3778_v34 = vld [vmem:[#allocation2 + $0x304] sm:$0xf]  ;;  %v2662_v41 = vor.u32 %v3714_v31, %v2659_v10  ;;  %v2890_v60 = vor.u32 %v3773_v55, %v2889_v54  ;;  %v3705_v62 = vld [vmem:[#allocation2 + $0xb4] sm:$0xf0] }
  0xc4   :  { %1065 = vmatpush.bf16.msra.mxu3 %v2966_v0  ;;  %v2915_v35 = vld [vmem:[#allocation2 + $0x310] sm:$0xf0]  ;;  %v2790_v42 = vor.u32 %v3746_v32, %v2787_v33  ;;  %v2745_v63 = vld [vmem:[#allocation2 + $0x1a8] sm:$0xf]  ;;  %v3018_v0 = vor.u32 %v3805_v57, %v3017_v56  ;;  %v3737_v1 = vld [vmem:[#allocation2 + $0x1b4] sm:$0xf0] }
  0xc5   :  { %1027 = vmatpush.bf16.msra.mxu0 %v2566_v6  ;;  %v2918_v45 = vor.u32 %v3778_v34, %v2915_v35  ;;  %v2873_v2 = vld [vmem:[#allocation2 + $0x2a8] sm:$0xf]  ;;  %v3769_v3 = vld [vmem:[#allocation2 + $0x2b4] sm:$0xf0]  ;;  %v2618_v6 = vor.u32 %v3705_v62, %v2617_v61 }
  0xc6   :  { %1040 = vmatpush.bf16.msra.mxu1 %v2694_v7  ;;  %v3001_v4 = vld [vmem:[#allocation2 + $0x3a8] sm:$0xf]  ;;  %v3801_v5 = vld [vmem:[#allocation2 + $0x3b4] sm:$0xf0]  ;;  %v2746_v7 = vor.u32 %v3737_v1, %v2745_v63 }
  0xc7   :  { %1053 = vmatpush.bf16.msra.mxu2 %v2822_v8  ;;  %v2874_v8 = vor.u32 %v3769_v3, %v2873_v2  ;;  %v2601_v9 = vld [vmem:[#allocation2 + $0x88] sm:$0xf]  ;;  %v3701_v12 = vld [vmem:[#allocation2 + $0x94] sm:$0xf0] }
  0xc8   :  { %1066 = vmatpush.bf16.msra.mxu3 %v2950_v16  ;;  %v2729_v13 = vld [vmem:[#allocation2 + $0x188] sm:$0xf]  ;;  %v3002_v16 = vor.u32 %v3801_v5, %v3001_v4  ;;  %v3733_v17 = vld [vmem:[#allocation2 + $0x194] sm:$0xf0] }
  0xc9   :  { %1028 = vmatpush.bf16.msra.mxu0 %v2550_v18  ;;  %v2857_v22 = vld [vmem:[#allocation2 + $0x288] sm:$0xf]  ;;  %v3765_v23 = vld [vmem:[#allocation2 + $0x294] sm:$0xf0]  ;;  %v2602_v18 = vor.u32 %v3701_v12, %v2601_v9  ;;  %v2730_v29 = vor.u32 %v3733_v17, %v2729_v13  ;;  %v2779_v12 = vld [vmem:[#allocation2 + $0x1f8] sm:$0xf0] }
  0xca   :  { %1041 = vmatpush.bf16.msra.mxu1 %v2678_v30  ;;  %v2985_v25 = vld [vmem:[#allocation2 + $0x388] sm:$0xf]  ;;  %v3797_v26 = vld [vmem:[#allocation2 + $0x394] sm:$0xf0]  ;;  %v2858_v19 = vor.u32 %v3765_v23, %v2857_v22  ;;  %v3775_v13 = vld [vmem:[#allocation2 + $0x2ec] sm:$0xf] }
  0xcb   :  { %1054 = vmatpush.bf16.msra.mxu2 %v2806_v21  ;;  %v2585_v30 = vld [vmem:[#allocation2 + $0x68] sm:$0xf]  ;;  %v3697_v21 = vld [vmem:[#allocation2 + $0x74] sm:$0xf0]  ;;  %v2986_v10 = vor.u32 %v3797_v26, %v2985_v25  ;;  %v3807_v23 = vld [vmem:[#allocation2 + $0x3ec] sm:$0xf] }
  0xcc   :  { %1067 = vmatpush.bf16.msra.mxu3 %v2934_v14  ;;  %v2713_v31 = vld [vmem:[#allocation2 + $0x168] sm:$0xf]  ;;  %v3729_v32 = vld [vmem:[#allocation2 + $0x174] sm:$0xf0]  ;;  %v2586_v11 = vor.u32 %v3697_v21, %v2585_v30  ;;  %v3035_v25 = vld [vmem:[#allocation2 + $0x3f8] sm:$0xf0] }
  0xcd   :  { %1029 = vmatpush.bf16.msra.mxu0 %v2534_v37  ;;  %v2841_v14 = vld [vmem:[#allocation2 + $0x268] sm:$0xf]  ;;  %v3761_v33 = vld [vmem:[#allocation2 + $0x274] sm:$0xf0]  ;;  %v2714_v15 = vor.u32 %v3729_v32, %v2713_v31  ;;  %v3707_v30 = vld [vmem:[#allocation2 + $0xcc] sm:$0xf] }
  0xce   :  { %1042 = vmatpush.bf16.msra.mxu1 %v2662_v41  ;;  %v2969_v34 = vld [vmem:[#allocation2 + $0x368] sm:$0xf]  ;;  %v3793_v35 = vld [vmem:[#allocation2 + $0x374] sm:$0xf0]  ;;  %v2842_v36 = vor.u32 %v3761_v33, %v2841_v14  ;;  %v2635_v21 = vld [vmem:[#allocation2 + $0xd8] sm:$0xf0] }
  0xcf   :  { %1055 = vmatpush.bf16.msra.mxu2 %v2790_v42  ;;  %v2569_v37 = vld [vmem:[#allocation2 + $0x48] sm:$0xf]  ;;  %v3693_v38 = vld [vmem:[#allocation2 + $0x54] sm:$0xf0]  ;;  %v2970_v40 = vor.u32 %v3793_v35, %v2969_v34  ;;  %v3739_v31 = vld [vmem:[#allocation2 + $0x1cc] sm:$0xf] }
  0xd0   :  { %1068 = vmatpush.bf16.msra.mxu3 %v2918_v45  ;;  %1030 = vmatmul.bf16.vlgmr.msra.gmra.mxu0 %v4176_v28  ;;  %v2697_v39 = vld [vmem:[#allocation2 + $0x148] sm:$0xf]  ;;  %v3725_v41 = vld [vmem:[#allocation2 + $0x154] sm:$0xf0]  ;;  %v2763_v32 = vld [vmem:[#allocation2 + $0x1d8] sm:$0xf0] }
  0xd1   :  { %1074 = vmatpush.bf16.msrb.mxu0 %v2650_v46  ;;  %1043 = vmatmul.bf16.vlgmr.msra.gmra.mxu1 %v4181_v20  ;;  %v2825_v42 = vld [vmem:[#allocation2 + $0x248] sm:$0xf]  ;;  %v3757_v43 = vld [vmem:[#allocation2 + $0x254] sm:$0xf0]  ;;  %v2570_v46 = vor.u32 %v3693_v38, %v2569_v37  ;;  %v3771_v14 = vld [vmem:[#allocation2 + $0x2cc] sm:$0xf] }
  0xd2   :  { %1087 = vmatpush.bf16.msrb.mxu1 %v2778_v47  ;;  %1056 = vmatmul.bf16.vlgmr.msra.gmra.mxu2 %v4166_v24  ;;  %v2953_v44 = vld [vmem:[#allocation2 + $0x348] sm:$0xf]  ;;  %v3789_v45 = vld [vmem:[#allocation2 + $0x354] sm:$0xf0]  ;;  %v2698_v47 = vor.u32 %v3725_v41, %v2697_v39  ;;  %v2891_v33 = vld [vmem:[#allocation2 + $0x2d8] sm:$0xf0] }
  0xd3   :  { %1100 = vmatpush.bf16.msrb.mxu2 %v2906_v48  ;;  %1069 = vmatmul.bf16.vlgmr.msra.gmra.mxu3 %v4171_v27  ;;  %v2826_v48 = vor.u32 %v3757_v43, %v2825_v42  ;;  %v2553_v49 = vld [vmem:[#allocation2 + $0x28] sm:$0xf]  ;;  %v3689_v50 = vld [vmem:[#allocation2 + $0x34] sm:$0xf0]  ;;  %v3803_v34 = vld [vmem:[#allocation2 + $0x3cc] sm:$0xf] }
  0xd4   :  { %1113 = vmatpush.bf16.msrb.mxu3 %v3034_v52  ;;  %v2681_v51 = vld [vmem:[#allocation2 + $0x128] sm:$0xf]  ;;  %v2954_v52 = vor.u32 %v3789_v45, %v2953_v44  ;;  %v3721_v53 = vld [vmem:[#allocation2 + $0x134] sm:$0xf0]  ;;  %v3019_v35 = vld [vmem:[#allocation2 + $0x3d8] sm:$0xf0] }
  0xd5   :  { %1075 = vmatpush.bf16.msrb.mxu0 %v2634_v58  ;;  %v2809_v54 = vld [vmem:[#allocation2 + $0x228] sm:$0xf]  ;;  %v3753_v55 = vld [vmem:[#allocation2 + $0x234] sm:$0xf0]  ;;  %v2554_v58 = vor.u32 %v3689_v50, %v2553_v49  ;;  %v2682_v61 = vor.u32 %v3721_v53, %v2681_v51  ;;  %v3703_v37 = vld [vmem:[#allocation2 + $0xac] sm:$0xf] }
  0xd6   :  { %1088 = vmatpush.bf16.msrb.mxu1 %v2762_v59  ;;  %v2937_v56 = vld [vmem:[#allocation2 + $0x328] sm:$0xf]  ;;  %v3785_v57 = vld [vmem:[#allocation2 + $0x334] sm:$0xf0]  ;;  %v2810_v62 = vor.u32 %v3753_v55, %v2809_v54  ;;  %v2619_v38 = vld [vmem:[#allocation2 + $0xb8] sm:$0xf0] }
  0xd7   :  { %1101 = vmatpush.bf16.msrb.mxu2 %v2890_v60  ;;  %v2537_v59 = vld [vmem:[#allocation2 + $0x8] sm:$0xf]  ;;  %v3685_v60 = vld [vmem:[#allocation2 + $0x14] sm:$0xf0]  ;;  %v2938_v2 = vor.u32 %v3785_v57, %v2937_v56  ;;  %v3735_v39 = vld [vmem:[#allocation2 + $0x1ac] sm:$0xf] }
  0xd8   :  { %1114 = vmatpush.bf16.msrb.mxu3 %v3018_v0  ;;  %v2665_v63 = vld [vmem:[#allocation2 + $0x108] sm:$0xf]  ;;  %v3717_v0 = vld [vmem:[#allocation2 + $0x114] sm:$0xf0]  ;;  %v2538_v9 = vor.u32 %v3685_v60, %v2537_v59  ;;  %v2747_v41 = vld [vmem:[#allocation2 + $0x1b8] sm:$0xf0] }
  0xd9   :  { %1076 = vmatpush.bf16.msrb.mxu0 %v2618_v6  ;;  %v2793_v1 = vld [vmem:[#allocation2 + $0x208] sm:$0xf]  ;;  %v3749_v3 = vld [vmem:[#allocation2 + $0x214] sm:$0xf0]  ;;  %v3711_v6 = vld [vmem:[#allocation2 + $0xec] sm:$0xf]  ;;  %v2666_v17 = vor.u32 %v3717_v0, %v2665_v63 }
  0xda   :  { %1089 = vmatpush.bf16.msrb.mxu1 %v2746_v7  ;;  %v2921_v4 = vld [vmem:[#allocation2 + $0x308] sm:$0xf]  ;;  %v3781_v5 = vld [vmem:[#allocation2 + $0x314] sm:$0xf0]  ;;  %v2651_v7 = vld [vmem:[#allocation2 + $0xf8] sm:$0xf0]  ;;  %v2794_v22 = vor.u32 %v3749_v3, %v2793_v1 }
  0xdb   :  { %1102 = vmatpush.bf16.msrb.mxu2 %v2874_v8  ;;  %v3743_v8 = vld [vmem:[#allocation2 + $0x1ec] sm:$0xf]  ;;  %v2922_v26 = vor.u32 %v3781_v5, %v2921_v4  ;;  %v2875_v43 = vld [vmem:[#allocation2 + $0x2b8] sm:$0xf0] }
  0xdc   :  { %1115 = vmatpush.bf16.msrb.mxu3 %v3002_v16  ;;  %v2907_v16 = vld [vmem:[#allocation2 + $0x2f8] sm:$0xf0]  ;;  %v3767_v42 = vld [vmem:[#allocation2 + $0x2ac] sm:$0xf] }
  0xdd   :  { %1077 = vmatpush.bf16.msrb.mxu0 %v2602_v18  ;;  %v2654_v18 = vor.u32 %v3711_v6, %v2651_v7  ;;  %v3799_v44 = vld [vmem:[#allocation2 + $0x3ac] sm:$0xf]  ;;  %v3003_v45 = vld [vmem:[#allocation2 + $0x3b8] sm:$0xf0] }
  0xde   :  { %1090 = vmatpush.bf16.msrb.mxu1 %v2730_v29  ;;  %v2782_v29 = vor.u32 %v3743_v8, %v2779_v12  ;;  %v3699_v49 = vld [vmem:[#allocation2 + $0x8c] sm:$0xf]  ;;  %v2603_v50 = vld [vmem:[#allocation2 + $0x98] sm:$0xf0] }
  0xdf   :  { %1103 = vmatpush.bf16.msrb.mxu2 %v2858_v19  ;;  %v2910_v19 = vor.u32 %v3775_v13, %v2907_v16  ;;  %v3731_v51 = vld [vmem:[#allocation2 + $0x18c] sm:$0xf]  ;;  %v2731_v53 = vld [vmem:[#allocation2 + $0x198] sm:$0xf0] }
  0xe0   :  { %1116 = vmatpush.bf16.msrb.mxu3 %v2986_v10  ;;  %v3038_v10 = vor.u32 %v3807_v23, %v3035_v25  ;;  %v3763_v54 = vld [vmem:[#allocation2 + $0x28c] sm:$0xf]  ;;  %v2859_v55 = vld [vmem:[#allocation2 + $0x298] sm:$0xf0]  ;;  %v2734_v59 = vor.u32 %v3731_v51, %v2731_v53 }
  0xe1   :  { %1078 = vmatpush.bf16.msrb.mxu0 %v2586_v11  ;;  %v2638_v11 = vor.u32 %v3707_v30, %v2635_v21  ;;  %v3795_v56 = vld [vmem:[#allocation2 + $0x38c] sm:$0xf]  ;;  %v2987_v57 = vld [vmem:[#allocation2 + $0x398] sm:$0xf0]  ;;  %v2862_v60 = vor.u32 %v3763_v54, %v2859_v55 }
  0xe2   :  { %1091 = vmatpush.bf16.msrb.mxu1 %v2714_v15  ;;  %v2766_v15 = vor.u32 %v3739_v31, %v2763_v32  ;;  %v3727_v63 = vld [vmem:[#allocation2 + $0x16c] sm:$0xf]  ;;  %v2990_v0 = vor.u32 %v3795_v56, %v2987_v57  ;;  %v2715_v1 = vld [vmem:[#allocation2 + $0x178] sm:$0xf0] }
  0xe3   :  { %1104 = vmatpush.bf16.msrb.mxu2 %v2842_v36  ;;  %v2894_v36 = vor.u32 %v3771_v14, %v2891_v33  ;;  %v2843_v3 = vld [vmem:[#allocation2 + $0x278] sm:$0xf0]  ;;  %v3791_v4 = vld [vmem:[#allocation2 + $0x36c] sm:$0xf]  ;;  %v2718_v7 = vor.u32 %v3727_v63, %v2715_v1 }
  0xe4   :  { %1117 = vmatpush.bf16.msrb.mxu3 %v2970_v40  ;;  %v3022_v40 = vor.u32 %v3803_v34, %v3019_v35  ;;  %v2971_v5 = vld [vmem:[#allocation2 + $0x378] sm:$0xf0]  ;;  %v3723_v13 = vld [vmem:[#allocation2 + $0x14c] sm:$0xf] }
  0xe5   :  { %1079 = vmatpush.bf16.msrb.mxu0 %v2570_v46  ;;  %v2622_v46 = vor.u32 %v3703_v37, %v2619_v38  ;;  %v2571_v12 = vld [vmem:[#allocation2 + $0x58] sm:$0xf0]  ;;  %v2974_v16 = vor.u32 %v3791_v4, %v2971_v5  ;;  %v3787_v25 = vld [vmem:[#allocation2 + $0x34c] sm:$0xf] }
  0xe6   :  { %1092 = vmatpush.bf16.msrb.mxu1 %v2698_v47  ;;  %v2750_v47 = vor.u32 %v3735_v39, %v2747_v41  ;;  %v2827_v23 = vld [vmem:[#allocation2 + $0x258] sm:$0xf0]  ;;  %v3687_v30 = vld [vmem:[#allocation2 + $0x2c] sm:$0xf] }
  0xe7   :  { %1105 = vmatpush.bf16.msrb.mxu2 %v2826_v48  ;;  %v2878_v48 = vor.u32 %v3767_v42, %v2875_v43  ;;  %v2555_v21 = vld [vmem:[#allocation2 + $0x38] sm:$0xf0]  ;;  %v3719_v31 = vld [vmem:[#allocation2 + $0x12c] sm:$0xf] }
  0xe8   :  { %1118 = vmatpush.bf16.msrb.mxu3 %v2954_v52  ;;  %v3006_v52 = vor.u32 %v3799_v44, %v3003_v45  ;;  %v2683_v32 = vld [vmem:[#allocation2 + $0x138] sm:$0xf0]  ;;  %v3751_v14 = vld [vmem:[#allocation2 + $0x22c] sm:$0xf] }
  0xe9   :  { %1080 = vmatpush.bf16.msrb.mxu0 %v2554_v58  ;;  %v2606_v58 = vor.u32 %v3699_v49, %v2603_v50  ;;  %v2811_v33 = vld [vmem:[#allocation2 + $0x238] sm:$0xf0]  ;;  %v3783_v34 = vld [vmem:[#allocation2 + $0x32c] sm:$0xf]  ;;  %v320_v50 = vld [vmem:[%s4287_s4] sm:$0xf] }
  0xea   :  { %1093 = vmatpush.bf16.msrb.mxu1 %v2682_v61  ;;  %v3695_v61 = vld [vmem:[#allocation2 + $0x6c] sm:$0xf]  ;;  %v2939_v35 = vld [vmem:[#allocation2 + $0x338] sm:$0xf0]  ;;  %v322_v51 = vperm.slane %v320_v50, 0 }
  0xeb   :  { %1106 = vmatpush.bf16.msrb.mxu2 %v2810_v62  ;;  %v2587_v62 = vld [vmem:[#allocation2 + $0x78] sm:$0xf0]  ;;  %v3683_v37 = vld [vmem:[#allocation2 + $0xc] sm:$0xf] }
  0xec   :  { %1119 = vmatpush.bf16.msrb.mxu3 %v2938_v2  ;;  %v3759_v2 = vld [vmem:[#allocation2 + $0x26c] sm:$0xf]  ;;  %v2590_v6 = vor.u32 %v3695_v61, %v2587_v62  ;;  %v2539_v38 = vld [vmem:[#allocation2 + $0x18] sm:$0xf0]  ;;  %v323_v61 = vperm.slane %v320_v50, 1 }
  0xed   :  { %1081 = vmatpush.bf16.msrb.mxu0 %v2538_v9  ;;  %v2846_v8 = vor.u32 %v3759_v2, %v2843_v3  ;;  %v3691_v9 = vld [vmem:[#allocation2 + $0x4c] sm:$0xf]  ;;  %v2667_v41 = vld [vmem:[#allocation2 + $0x118] sm:$0xf0] }
  0xee   :  { %1094 = vmatpush.bf16.msrb.mxu1 %v2666_v17  ;;  %v2699_v17 = vld [vmem:[#allocation2 + $0x158] sm:$0xf0]  ;;  %v3715_v39 = vld [vmem:[#allocation2 + $0x10c] sm:$0xf] }
  0xef   :  { %1107 = vmatpush.bf16.msrb.mxu2 %v2794_v22  ;;  %v3755_v22 = vld [vmem:[#allocation2 + $0x24c] sm:$0xf]  ;;  %v2795_v43 = vld [vmem:[#allocation2 + $0x218] sm:$0xf0] }
  0xf0   :  { %1120 = vmatpush.bf16.msrb.mxu3 %v2922_v26  ;;  %1082 = vmatmul.bf16.vlgmr.msrb.gmra.mxu0 %v4176_v28  ;;  %v2955_v26 = vld [vmem:[#allocation2 + $0x358] sm:$0xf0]  ;;  %v3747_v42 = vld [vmem:[#allocation2 + $0x20c] sm:$0xf] }
  0xf1   :  { %1126 = vmatpush.bf16.msra.mxu0 %v2654_v18  ;;  %1095 = vmatmul.bf16.vlgmr.msrb.gmra.mxu1 %v4181_v20  ;;  %v2574_v18 = vor.u32 %v3691_v9, %v2571_v12  ;;  %v3779_v44 = vld [vmem:[#allocation2 + $0x30c] sm:$0xf]  ;;  %v2923_v45 = vld [vmem:[#allocation2 + $0x318] sm:$0xf0] }
  0xf2   :  { %1139 = vmatpush.bf16.msra.mxu1 %v2782_v29  ;;  %1108 = vmatmul.bf16.vlgmr.msrb.gmra.mxu2 %v4166_v24  ;;  %v2702_v29 = vor.u32 %v3723_v13, %v2699_v17  ;;  %v2926_v49 = vor.u32 %v3779_v44, %v2923_v45  ;;  %v324_v13 = vperm.slane %v320_v50, 2 }
  0xf3   :  { %1152 = vmatpush.bf16.msra.mxu2 %v2910_v19  ;;  %1121 = vmatmul.bf16.vlgmr.msrb.gmra.mxu3 %v4171_v27  ;;  %v2830_v19 = vor.u32 %v3755_v22, %v2827_v23 }
  0xf4   :  { %1165 = vmatpush.bf16.msra.mxu3 %v3038_v10  ;;  %v2958_v10 = vor.u32 %v3787_v25, %v2955_v26 }
  0xf5   :  { %1127 = vmatpush.bf16.msra.mxu0 %v2638_v11  ;;  %v2558_v11 = vor.u32 %v3687_v30, %v2555_v21 }
  0xf6   :  { %1140 = vmatpush.bf16.msra.mxu1 %v2766_v15  ;;  %v2686_v15 = vor.u32 %v3719_v31, %v2683_v32  ;;  %v325_v32 = vperm.slane %v320_v50, 3 }
  0xf7   :  { %1153 = vmatpush.bf16.msra.mxu2 %v2894_v36  ;;  %v2814_v36 = vor.u32 %v3751_v14, %v2811_v33 }
  0xf8   :  { %1166 = vmatpush.bf16.msra.mxu3 %v3022_v40  ;;  %v2942_v40 = vor.u32 %v3783_v34, %v2939_v35 }
  0xf9   :  { %1128 = vmatpush.bf16.msra.mxu0 %v2622_v46  ;;  %v2542_v46 = vor.u32 %v3683_v37, %v2539_v38 }
  0xfa   :  { %1141 = vmatpush.bf16.msra.mxu1 %v2750_v47  ;;  %v2670_v47 = vor.u32 %v3715_v39, %v2667_v41 }
  0xfb   :  { %1154 = vmatpush.bf16.msra.mxu2 %v2878_v48  ;;  %v2798_v48 = vor.u32 %v3747_v42, %v2795_v43 }
  0xfc   :  { %1167 = vmatpush.bf16.msra.mxu3 %v3006_v52 }
  0xfd   :  { %1129 = vmatpush.bf16.msra.mxu0 %v2606_v58 }
  0xfe   :  { %1142 = vmatpush.bf16.msra.mxu1 %v2734_v59 }
  0xff   :  { %1155 = vmatpush.bf16.msra.mxu2 %v2862_v60 }
 0x100   :  { %1168 = vmatpush.bf16.msra.mxu3 %v2990_v0 }
 0x101   :  { %1130 = vmatpush.bf16.msra.mxu0 %v2590_v6 }
 0x102   :  { %1143 = vmatpush.bf16.msra.mxu1 %v2718_v7 }
 0x103   :  { %1156 = vmatpush.bf16.msra.mxu2 %v2846_v8 }
 0x104   :  { %1169 = vmatpush.bf16.msra.mxu3 %v2974_v16 }
 0x105   :  { %1131 = vmatpush.bf16.msra.mxu0 %v2574_v18 }
 0x106   :  { %1144 = vmatpush.bf16.msra.mxu1 %v2702_v29 }
 0x107   :  { %1157 = vmatpush.bf16.msra.mxu2 %v2830_v19 }
 0x108   :  { %1170 = vmatpush.bf16.msra.mxu3 %v2958_v10 }
 0x109   :  { %1132 = vmatpush.bf16.msra.mxu0 %v2558_v11 }
 0x10a   :  { %1145 = vmatpush.bf16.msra.mxu1 %v2686_v15 }
 0x10b   :  { %1158 = vmatpush.bf16.msra.mxu2 %v2814_v36 }
 0x10c   :  { %1171 = vmatpush.bf16.msra.mxu3 %v2942_v40 }
 0x10d   :  { %1133 = vmatpush.bf16.msra.mxu0 %v2542_v46 }
 0x10e   :  { %1146 = vmatpush.bf16.msra.mxu1 %v2670_v47 }
 0x10f   :  { %1159 = vmatpush.bf16.msra.mxu2 %v2798_v48 }
 0x110   :  { %1172 = vmatpush.bf16.msra.mxu3 %v2926_v49  ;;  %1134 = vmatmul.bf16.vlgmr.msra.gmra.mxu0 %v4176_v28 }
 0x111   :  { %1147 = vmatmul.bf16.vlgmr.msra.gmra.mxu1 %v4181_v20 }
 0x112   :  { %1160 = vmatmul.bf16.vlgmr.msra.gmra.mxu2 %v4166_v24 }
 0x113   :  { %1173 = vmatmul.bf16.vlgmr.msra.gmra.mxu3 %v4171_v27 }
 0x12d   :  { %v979_v52 = vpop.f32.mrf.mxu0 }
 0x12e   :  { %v980_v53 = vadd.f32 %v979_v52, %v322_v51  ;;  %v992_v54 = vpop.f32.mrf.mxu1 }
 0x130   :  { %v993_v55 = vadd.f32 %v992_v54, %v980_v53 }
 0x135   :  { %v1005_v56 = vpop.f32.mrf.mxu2  ;;  %v981_v28 = vpop.f32.mrf.mxu0 }
 0x136   :  { %v1006_v57 = vadd.f32 %v1005_v56, %v993_v55  ;;  %v1018_v58 = vpop.f32.mrf.mxu3  ;;  %v994_v20 = vpop.f32.mrf.mxu1 }
 0x138   :  { %v4202_v59 = vadd.f32 %v1018_v58, %v1006_v57 }
 0x13a   :  { %v1178_v24 = vmax.f32 %v4202_v59, 0.0 }
 0x13d   :  { %v1007_v60 = vpop.f32.mrf.mxu2 }
 0x13e   :  { %v1020_v27 = vpop.f32.mrf.mxu3 }
 0x14d   :  { %v1031_v62 = vpop.f32.mrf.mxu0 }
 0x14e   :  { %v1032_v63 = vadd.f32 %v1031_v62, %v323_v61  ;;  %v1044_v0 = vpop.f32.mrf.mxu1 }
 0x150   :  { %v1045_v1 = vadd.f32 %v1044_v0, %v1032_v63 }
 0x155   :  { %v1057_v2 = vpop.f32.mrf.mxu2  ;;  %v1033_v6 = vpop.f32.mrf.mxu0 }
 0x156   :  { %v1058_v3 = vadd.f32 %v1057_v2, %v1045_v1  ;;  %v1070_v4 = vpop.f32.mrf.mxu3  ;;  %v1046_v7 = vpop.f32.mrf.mxu1 }
 0x158   :  { %v4205_v5 = vadd.f32 %v1070_v4, %v1058_v3 }
 0x15a   :  { %v1179_v8 = vmax.f32 %v4205_v5, 0.0 }
 0x15d   :  { %v1059_v9 = vpop.f32.mrf.mxu2 }
 0x15e   :  { %v1072_v12 = vpop.f32.mrf.mxu3 }
 0x16d   :  { %v1083_v16 = vpop.f32.mrf.mxu0 }
 0x16e   :  { %v1084_v17 = vadd.f32 %v1083_v16, %v324_v13  ;;  %v1096_v22 = vpop.f32.mrf.mxu1 }
 0x170   :  { %v1097_v23 = vadd.f32 %v1096_v22, %v1084_v17 }
 0x175   :  { %v1109_v25 = vpop.f32.mrf.mxu2  ;;  %v1085_v19 = vpop.f32.mrf.mxu0 }
 0x176   :  { %v1110_v26 = vadd.f32 %v1109_v25, %v1097_v23  ;;  %v1122_v18 = vpop.f32.mrf.mxu3  ;;  %v1098_v30 = vpop.f32.mrf.mxu1 }
 0x178   :  { %v4208_v29 = vadd.f32 %v1122_v18, %v1110_v26 }
 0x17a   :  { %v1180_v21 = vmax.f32 %v4208_v29, 0.0 }
 0x17d   :  { %v1111_v31 = vpop.f32.mrf.mxu2 }
 0x17e   :  { %v1124_v10 = vpop.f32.mrf.mxu3 }
 0x18d   :  { %v1135_v14 = vpop.f32.mrf.mxu0 }
 0x18e   :  { %v1136_v33 = vadd.f32 %v1135_v14, %v325_v32  ;;  %v1148_v34 = vpop.f32.mrf.mxu1 }
 0x190   :  { %v1149_v35 = vadd.f32 %v1148_v34, %v1136_v33 }
 0x195   :  { %v1161_v11 = vpop.f32.mrf.mxu2  ;;  %v1137_v37 = vpop.f32.mrf.mxu0 }
 0x196   :  { %v1162_v15 = vadd.f32 %v1161_v11, %v1149_v35  ;;  %v1174_v36 = vpop.f32.mrf.mxu3  ;;  %v1150_v38 = vpop.f32.mrf.mxu1 }
 0x198   :  { %v4211_v39 = vadd.f32 %v1174_v36, %v1162_v15 }
 0x19a   :  { %v1181_v40 = vmax.f32 %v4211_v39, 0.0 }
 0x19d   :  { %v1163_v41 = vpop.f32.mrf.mxu2 }
 0x19e   :  { %v1176_v42 = vpop.f32.mrf.mxu3 }
 0x19f   :  { %4075 = dma.done.wait [#allocation5 + $0x1], 16384 }
 0x1a0   :  { %4076 = vsyncadd [#allocation5 + $0x1], 4294950912  ;;  %v3153_v43 = vld [vmem:[#allocation3 + $0xe0] sm:$0xf]  ;;  %v3840_v44 = vld [vmem:[#allocation3 + $0xec] sm:$0xf0] }
 0x1a1   :  { %v3281_v45 = vld [vmem:[#allocation3 + $0x1e0] sm:$0xf]  ;;  %v3154_v46 = vor.u32 %v3840_v44, %v3153_v43  ;;  %v3872_v47 = vld [vmem:[#allocation3 + $0x1ec] sm:$0xf0] }
 0x1a2   :  { %v3409_v48 = vld [vmem:[#allocation3 + $0x2e0] sm:$0xf]  ;;  %v3904_v49 = vld [vmem:[#allocation3 + $0x2ec] sm:$0xf0]  ;;  %v3282_v50 = vor.u32 %v3872_v47, %v3281_v45 }
 0x1a3   :  { %v3410_v51 = vor.u32 %v3904_v49, %v3409_v48  ;;  %v3537_v52 = vld [vmem:[#allocation3 + $0x3e0] sm:$0xf]  ;;  %v3936_v53 = vld [vmem:[#allocation3 + $0x3ec] sm:$0xf0]  ;;  %1966 = vmatpush.bf16.msrb.mxu0 %v3154_v46 }
 0x1a4   :  { %v3137_v54 = vld [vmem:[#allocation3 + $0xc0] sm:$0xf]  ;;  %v3538_v55 = vor.u32 %v3936_v53, %v3537_v52  ;;  %v3836_v56 = vld [vmem:[#allocation3 + $0xcc] sm:$0xf0]  ;;  %1979 = vmatpush.bf16.msrb.mxu1 %v3282_v50 }
 0x1a5   :  { %v3265_v57 = vld [vmem:[#allocation3 + $0x1c0] sm:$0xf]  ;;  %v3868_v58 = vld [vmem:[#allocation3 + $0x1cc] sm:$0xf0]  ;;  %1992 = vmatpush.bf16.msrb.mxu2 %v3410_v51  ;;  %v3138_v28 = vor.u32 %v3836_v56, %v3137_v54 }
 0x1a6   :  { %v3266_v20 = vor.u32 %v3868_v58, %v3265_v57  ;;  %v3393_v60 = vld [vmem:[#allocation3 + $0x2c0] sm:$0xf]  ;;  %v3900_v27 = vld [vmem:[#allocation3 + $0x2cc] sm:$0xf0]  ;;  %2005 = vmatpush.bf16.msrb.mxu3 %v3538_v55 }
 0x1a7   :  { %v3521_v61 = vld [vmem:[#allocation3 + $0x3c0] sm:$0xf]  ;;  %v3394_v62 = vor.u32 %v3900_v27, %v3393_v60  ;;  %v3932_v63 = vld [vmem:[#allocation3 + $0x3cc] sm:$0xf0]  ;;  %1967 = vmatpush.bf16.msrb.mxu0 %v3138_v28 }
 0x1a8   :  { %v3121_v0 = vld [vmem:[#allocation3 + $0xa0] sm:$0xf]  ;;  %v3832_v1 = vld [vmem:[#allocation3 + $0xac] sm:$0xf0]  ;;  %v3522_v2 = vor.u32 %v3932_v63, %v3521_v61  ;;  %1980 = vmatpush.bf16.msrb.mxu1 %v3266_v20 }
 0x1a9   :  { %v3249_v3 = vld [vmem:[#allocation3 + $0x1a0] sm:$0xf]  ;;  %v3864_v4 = vld [vmem:[#allocation3 + $0x1ac] sm:$0xf0]  ;;  %v3122_v7 = vor.u32 %v3832_v1, %v3121_v0  ;;  %1993 = vmatpush.bf16.msrb.mxu2 %v3394_v62 }
 0x1aa   :  { %v3377_v6 = vld [vmem:[#allocation3 + $0x2a0] sm:$0xf]  ;;  %v3896_v9 = vld [vmem:[#allocation3 + $0x2ac] sm:$0xf0]  ;;  %v3250_v16 = vor.u32 %v3864_v4, %v3249_v3  ;;  %2006 = vmatpush.bf16.msrb.mxu3 %v3522_v2 }
 0x1ab   :  { %v3505_v12 = vld [vmem:[#allocation3 + $0x3a0] sm:$0xf]  ;;  %v3928_v13 = vld [vmem:[#allocation3 + $0x3ac] sm:$0xf0]  ;;  %v3378_v17 = vor.u32 %v3896_v9, %v3377_v6  ;;  %1968 = vmatpush.bf16.msrb.mxu0 %v3122_v7 }
 0x1ac   :  { %v3105_v22 = vld [vmem:[#allocation3 + $0x80] sm:$0xf]  ;;  %v3828_v23 = vld [vmem:[#allocation3 + $0x8c] sm:$0xf0]  ;;  %v3506_v26 = vor.u32 %v3928_v13, %v3505_v12  ;;  %1981 = vmatpush.bf16.msrb.mxu1 %v3250_v16 }
 0x1ad   :  { %v3233_v25 = vld [vmem:[#allocation3 + $0x180] sm:$0xf]  ;;  %v3860_v18 = vld [vmem:[#allocation3 + $0x18c] sm:$0xf0]  ;;  %v3106_v32 = vor.u32 %v3828_v23, %v3105_v22  ;;  %1994 = vmatpush.bf16.msrb.mxu2 %v3378_v17  ;;  %v3838_v23 = vld [vmem:[#allocation3 + $0xe4] sm:$0xf] }
 0x1ae   :  { %v3361_v19 = vld [vmem:[#allocation3 + $0x280] sm:$0xf]  ;;  %v3892_v30 = vld [vmem:[#allocation3 + $0x28c] sm:$0xf0]  ;;  %v3234_v14 = vor.u32 %v3860_v18, %v3233_v25  ;;  %2007 = vmatpush.bf16.msrb.mxu3 %v3506_v26  ;;  %v3155_v25 = vld [vmem:[#allocation3 + $0xf0] sm:$0xf0] }
 0x1af   :  { %v3489_v31 = vld [vmem:[#allocation3 + $0x380] sm:$0xf]  ;;  %v3924_v10 = vld [vmem:[#allocation3 + $0x38c] sm:$0xf0]  ;;  %v3362_v33 = vor.u32 %v3892_v30, %v3361_v19  ;;  %1969 = vmatpush.bf16.msrb.mxu0 %v3106_v32  ;;  %v3870_v26 = vld [vmem:[#allocation3 + $0x1e4] sm:$0xf] }
 0x1b0   :  { %v3089_v34 = vld [vmem:[#allocation3 + $0x60] sm:$0xf]  ;;  %v3824_v35 = vld [vmem:[#allocation3 + $0x6c] sm:$0xf0]  ;;  %v3490_v15 = vor.u32 %v3924_v10, %v3489_v31  ;;  %1982 = vmatpush.bf16.msrb.mxu1 %v3234_v14  ;;  %v3283_v19 = vld [vmem:[#allocation3 + $0x1f0] sm:$0xf0] }
 0x1b1   :  { %v3217_v11 = vld [vmem:[#allocation3 + $0x160] sm:$0xf]  ;;  %v3856_v36 = vld [vmem:[#allocation3 + $0x16c] sm:$0xf0]  ;;  %v3090_v43 = vor.u32 %v3824_v35, %v3089_v34  ;;  %1995 = vmatpush.bf16.msrb.mxu2 %v3362_v33  ;;  %v3902_v30 = vld [vmem:[#allocation3 + $0x2e4] sm:$0xf]  ;;  %v3158_v35 = vor.u32 %v3838_v23, %v3155_v25 }
 0x1b2   :  { %v3345_v37 = vld [vmem:[#allocation3 + $0x260] sm:$0xf]  ;;  %v3888_v38 = vld [vmem:[#allocation3 + $0x26c] sm:$0xf0]  ;;  %v3218_v44 = vor.u32 %v3856_v36, %v3217_v11  ;;  %2008 = vmatpush.bf16.msrb.mxu3 %v3490_v15  ;;  %v3411_v31 = vld [vmem:[#allocation3 + $0x2f0] sm:$0xf0]  ;;  %v3286_v11 = vor.u32 %v3870_v26, %v3283_v19 }
 0x1b3   :  { %v3473_v41 = vld [vmem:[#allocation3 + $0x360] sm:$0xf]  ;;  %v3920_v42 = vld [vmem:[#allocation3 + $0x36c] sm:$0xf0]  ;;  %v3346_v45 = vor.u32 %v3888_v38, %v3345_v37  ;;  %1970 = vmatpush.bf16.msrb.mxu0 %v3090_v43  ;;  %v3934_v14 = vld [vmem:[#allocation3 + $0x3e4] sm:$0xf]  ;;  %v3414_v15 = vor.u32 %v3902_v30, %v3411_v31 }
 0x1b4   :  { %v3073_v46 = vld [vmem:[#allocation3 + $0x40] sm:$0xf]  ;;  %v3820_v47 = vld [vmem:[#allocation3 + $0x4c] sm:$0xf0]  ;;  %v3474_v49 = vor.u32 %v3920_v42, %v3473_v41  ;;  %1983 = vmatpush.bf16.msrb.mxu1 %v3218_v44  ;;  %v3539_v33 = vld [vmem:[#allocation3 + $0x3f0] sm:$0xf0] }
 0x1b5   :  { %v3201_v48 = vld [vmem:[#allocation3 + $0x140] sm:$0xf]  ;;  %v3852_v50 = vld [vmem:[#allocation3 + $0x14c] sm:$0xf0]  ;;  %v3074_v55 = vor.u32 %v3820_v47, %v3073_v46  ;;  %1996 = vmatpush.bf16.msrb.mxu2 %v3346_v45  ;;  %v3834_v36 = vld [vmem:[#allocation3 + $0xc4] sm:$0xf]  ;;  %v3542_v41 = vor.u32 %v3934_v14, %v3539_v33  ;;  %v4217_v45 = vpack.c.bf16 %v1180_v21, %v1180_v21  ;;  %v4232_v21 = vpack.c.bf16 %v1179_v8, %v1179_v8 }
 0x1b6   :  { %v3329_v51 = vld [vmem:[#allocation3 + $0x240] sm:$0xf]  ;;  %v3884_v52 = vld [vmem:[#allocation3 + $0x24c] sm:$0xf0]  ;;  %v3202_v56 = vor.u32 %v3852_v50, %v3201_v48  ;;  %2009 = vmatpush.bf16.msrb.mxu3 %v3474_v49  ;;  %v3139_v37 = vld [vmem:[#allocation3 + $0xd0] sm:$0xf0]  ;;  %v4222_v48 = vpack.c.bf16 %v1181_v40, %v1181_v40  ;;  %v4227_v49 = vpack.c.bf16 %v1178_v24, %v1178_v24 }
 0x1b7   :  { %v3457_v53 = vld [vmem:[#allocation3 + $0x340] sm:$0xf]  ;;  %v3916_v54 = vld [vmem:[#allocation3 + $0x34c] sm:$0xf0]  ;;  %v3330_v57 = vor.u32 %v3884_v52, %v3329_v51  ;;  %1971 = vmatpush.bf16.msrb.mxu0 %v3074_v55  ;;  %v3866_v38 = vld [vmem:[#allocation3 + $0x1c4] sm:$0xf]  ;;  %v3142_v29 = vor.u32 %v3834_v36, %v3139_v37 }
 0x1b8   :  { %v3057_v58 = vld [vmem:[#allocation3 + $0x20] sm:$0xf]  ;;  %v3816_v28 = vld [vmem:[#allocation3 + $0x2c] sm:$0xf0]  ;;  %v3458_v60 = vor.u32 %v3916_v54, %v3457_v53  ;;  %1984 = vmatpush.bf16.msrb.mxu1 %v3202_v56  ;;  %v3267_v42 = vld [vmem:[#allocation3 + $0x1d0] sm:$0xf0] }
 0x1b9   :  { %v3185_v20 = vld [vmem:[#allocation3 + $0x120] sm:$0xf]  ;;  %v3848_v27 = vld [vmem:[#allocation3 + $0x12c] sm:$0xf0]  ;;  %v3058_v1 = vor.u32 %v3816_v28, %v3057_v58  ;;  %1997 = vmatpush.bf16.msrb.mxu2 %v3330_v57  ;;  %v3898_v43 = vld [vmem:[#allocation3 + $0x2c4] sm:$0xf]  ;;  %v3270_v50 = vor.u32 %v3866_v38, %v3267_v42 }
 0x1ba   :  { %v3313_v61 = vld [vmem:[#allocation3 + $0x220] sm:$0xf]  ;;  %v3880_v62 = vld [vmem:[#allocation3 + $0x22c] sm:$0xf0]  ;;  %v3186_v4 = vor.u32 %v3848_v27, %v3185_v20  ;;  %2010 = vmatpush.bf16.msrb.mxu3 %v3458_v60  ;;  %v3395_v44 = vld [vmem:[#allocation3 + $0x2d0] sm:$0xf0] }
 0x1bb   :  { %v3441_v63 = vld [vmem:[#allocation3 + $0x320] sm:$0xf]  ;;  %v3912_v0 = vld [vmem:[#allocation3 + $0x32c] sm:$0xf0]  ;;  %v3314_v6 = vor.u32 %v3880_v62, %v3313_v61  ;;  %1972 = vmatpush.bf16.msrb.mxu0 %v3058_v1  ;;  %v3930_v46 = vld [vmem:[#allocation3 + $0x3c4] sm:$0xf]  ;;  %v3398_v39 = vor.u32 %v3898_v43, %v3395_v44 }
 0x1bc   :  { %v3041_v2 = vld [vmem:[#allocation3] sm:$0xf]  ;;  %v3812_v3 = vld [vmem:[#allocation3 + $0xc] sm:$0xf0]  ;;  %v3442_v13 = vor.u32 %v3912_v0, %v3441_v63  ;;  %1985 = vmatpush.bf16.msrb.mxu1 %v3186_v4  ;;  %v3523_v47 = vld [vmem:[#allocation3 + $0x3d0] sm:$0xf0] }
 0x1bd   :  { %v3169_v7 = vld [vmem:[#allocation3 + $0x100] sm:$0xf]  ;;  %v3844_v9 = vld [vmem:[#allocation3 + $0x10c] sm:$0xf0]  ;;  %v3042_v18 = vor.u32 %v3812_v3, %v3041_v2  ;;  %1998 = vmatpush.bf16.msrb.mxu2 %v3314_v6  ;;  %v3830_v51 = vld [vmem:[#allocation3 + $0xa4] sm:$0xf]  ;;  %v3526_v59 = vor.u32 %v3930_v46, %v3523_v47 }
 0x1be   :  { %v3297_v12 = vld [vmem:[#allocation3 + $0x200] sm:$0xf]  ;;  %v3876_v16 = vld [vmem:[#allocation3 + $0x20c] sm:$0xf0]  ;;  %v3170_v10 = vor.u32 %v3844_v9, %v3169_v7  ;;  %2011 = vmatpush.bf16.msrb.mxu3 %v3442_v13  ;;  %v3123_v40 = vld [vmem:[#allocation3 + $0xb0] sm:$0xf0] }
 0x1bf   :  { %v3425_v17 = vld [vmem:[#allocation3 + $0x300] sm:$0xf]  ;;  %v3908_v22 = vld [vmem:[#allocation3 + $0x30c] sm:$0xf0]  ;;  %v3298_v32 = vor.u32 %v3876_v16, %v3297_v12  ;;  %1973 = vmatpush.bf16.msrb.mxu0 %v3042_v18  ;;  %v3862_v52 = vld [vmem:[#allocation3 + $0x1a4] sm:$0xf]  ;;  %v3126_v5 = vor.u32 %v3830_v51, %v3123_v40 }
 0x1c0   :  { %v3426_v34 = vor.u32 %v3908_v22, %v3425_v17  ;;  %1986 = vmatpush.bf16.msrb.mxu1 %v3170_v10  ;;  %v3251_v53 = vld [vmem:[#allocation3 + $0x1b0] sm:$0xf0]  ;;  %v3894_v24 = vld [vmem:[#allocation3 + $0x2a4] sm:$0xf] }
 0x1c1   :  { %1999 = vmatpush.bf16.msrb.mxu2 %v3298_v32  ;;  %v3379_v54 = vld [vmem:[#allocation3 + $0x2b0] sm:$0xf0]  ;;  %v3926_v55 = vld [vmem:[#allocation3 + $0x3a4] sm:$0xf]  ;;  %v3254_v8 = vor.u32 %v3862_v52, %v3251_v53 }
 0x1c2   :  { %2012 = vmatpush.bf16.msrb.mxu3 %v3426_v34  ;;  %v3507_v56 = vld [vmem:[#allocation3 + $0x3b0] sm:$0xf0]  ;;  %1974 = vmatmul.bf16.vlgmr.msrb.gmra.mxu0 %v4227_v49  ;;  %v3382_v57 = vor.u32 %v3894_v24, %v3379_v54  ;;  %v3826_v58 = vld [vmem:[#allocation3 + $0x84] sm:$0xf] }
 0x1c3   :  { %2018 = vmatpush.bf16.msra.mxu0 %v3158_v35  ;;  %1987 = vmatmul.bf16.vlgmr.msrb.gmra.mxu1 %v4232_v21  ;;  %v3107_v28 = vld [vmem:[#allocation3 + $0x90] sm:$0xf0]  ;;  %v3858_v20 = vld [vmem:[#allocation3 + $0x184] sm:$0xf]  ;;  %v3510_v60 = vor.u32 %v3926_v55, %v3507_v56 }
 0x1c4   :  { %2031 = vmatpush.bf16.msra.mxu1 %v3286_v11  ;;  %2000 = vmatmul.bf16.vlgmr.msrb.gmra.mxu2 %v4217_v45  ;;  %v3235_v27 = vld [vmem:[#allocation3 + $0x190] sm:$0xf0]  ;;  %v3890_v61 = vld [vmem:[#allocation3 + $0x284] sm:$0xf]  ;;  %v3110_v1 = vor.u32 %v3826_v58, %v3107_v28  ;;  %v3873_v28 = vld [vmem:[#allocation3 + $0x1f4] sm:$0xf0] }
 0x1c5   :  { %2044 = vmatpush.bf16.msra.mxu2 %v3414_v15  ;;  %2013 = vmatmul.bf16.vlgmr.msrb.gmra.mxu3 %v4222_v48  ;;  %v3363_v62 = vld [vmem:[#allocation3 + $0x290] sm:$0xf0]  ;;  %v3922_v63 = vld [vmem:[#allocation3 + $0x384] sm:$0xf]  ;;  %v3238_v2 = vor.u32 %v3858_v20, %v3235_v27  ;;  %v3417_v20 = vld [vmem:[#allocation3 + $0x2e8] sm:$0xf] }
 0x1c6   :  { %2057 = vmatpush.bf16.msra.mxu3 %v3542_v41  ;;  %v3491_v0 = vld [vmem:[#allocation3 + $0x390] sm:$0xf0]  ;;  %v3366_v3 = vor.u32 %v3890_v61, %v3363_v62  ;;  %v3822_v4 = vld [vmem:[#allocation3 + $0x64] sm:$0xf]  ;;  %v3545_v62 = vld [vmem:[#allocation3 + $0x3e8] sm:$0xf] }
 0x1c7   :  { %2019 = vmatpush.bf16.msra.mxu0 %v3142_v29  ;;  %v3091_v6 = vld [vmem:[#allocation3 + $0x70] sm:$0xf0]  ;;  %v3854_v7 = vld [vmem:[#allocation3 + $0x164] sm:$0xf]  ;;  %v3494_v9 = vor.u32 %v3922_v63, %v3491_v0  ;;  %v3937_v63 = vld [vmem:[#allocation3 + $0x3f4] sm:$0xf0] }
 0x1c8   :  { %2032 = vmatpush.bf16.msra.mxu1 %v3270_v50  ;;  %v3219_v12 = vld [vmem:[#allocation3 + $0x170] sm:$0xf0]  ;;  %v3886_v13 = vld [vmem:[#allocation3 + $0x264] sm:$0xf]  ;;  %v3094_v23 = vor.u32 %v3822_v4, %v3091_v6  ;;  %v3145_v4 = vld [vmem:[#allocation3 + $0xc8] sm:$0xf] }
 0x1c9   :  { %2045 = vmatpush.bf16.msra.mxu2 %v3398_v39  ;;  %v3347_v16 = vld [vmem:[#allocation3 + $0x270] sm:$0xf0]  ;;  %v3918_v17 = vld [vmem:[#allocation3 + $0x364] sm:$0xf]  ;;  %v3222_v25 = vor.u32 %v3854_v7, %v3219_v12  ;;  %v3837_v6 = vld [vmem:[#allocation3 + $0xd4] sm:$0xf0] }
 0x1ca   :  { %2058 = vmatpush.bf16.msra.mxu3 %v3526_v59  ;;  %v3475_v22 = vld [vmem:[#allocation3 + $0x370] sm:$0xf0]  ;;  %v3350_v26 = vor.u32 %v3886_v13, %v3347_v16  ;;  %v3818_v18 = vld [vmem:[#allocation3 + $0x44] sm:$0xf]  ;;  %v3273_v7 = vld [vmem:[#allocation3 + $0x1c8] sm:$0xf] }
 0x1cb   :  { %2020 = vmatpush.bf16.msra.mxu0 %v3126_v5  ;;  %v3075_v19 = vld [vmem:[#allocation3 + $0x50] sm:$0xf0]  ;;  %v3850_v30 = vld [vmem:[#allocation3 + $0x144] sm:$0xf]  ;;  %v3478_v31 = vor.u32 %v3918_v17, %v3475_v22  ;;  %v3161_v5 = vld [vmem:[#allocation3 + $0xe8] sm:$0xf] }
 0x1cc   :  { %2033 = vmatpush.bf16.msra.mxu1 %v3254_v8  ;;  %v3203_v10 = vld [vmem:[#allocation3 + $0x150] sm:$0xf0]  ;;  %v3882_v32 = vld [vmem:[#allocation3 + $0x244] sm:$0xf]  ;;  %v3078_v35 = vor.u32 %v3818_v18, %v3075_v19  ;;  %v3841_v8 = vld [vmem:[#allocation3 + $0xf4] sm:$0xf0] }
 0x1cd   :  { %2046 = vmatpush.bf16.msra.mxu2 %v3382_v57  ;;  %v3331_v14 = vld [vmem:[#allocation3 + $0x250] sm:$0xf0]  ;;  %v3914_v33 = vld [vmem:[#allocation3 + $0x344] sm:$0xf]  ;;  %v3206_v11 = vor.u32 %v3850_v30, %v3203_v10  ;;  %v3289_v57 = vld [vmem:[#allocation3 + $0x1e8] sm:$0xf] }
 0x1ce   :  { %2059 = vmatpush.bf16.msra.mxu3 %v3510_v60  ;;  %v3459_v34 = vld [vmem:[#allocation3 + $0x350] sm:$0xf0]  ;;  %v3334_v15 = vor.u32 %v3882_v32, %v3331_v14  ;;  %v3814_v36 = vld [vmem:[#allocation3 + $0x24] sm:$0xf]  ;;  %v3905_v60 = vld [vmem:[#allocation3 + $0x2f4] sm:$0xf0] }
 0x1cf   :  { %2021 = vmatpush.bf16.msra.mxu0 %v3110_v1  ;;  %v3059_v37 = vld [vmem:[#allocation3 + $0x30] sm:$0xf0]  ;;  %v3846_v38 = vld [vmem:[#allocation3 + $0x124] sm:$0xf]  ;;  %v3462_v41 = vor.u32 %v3914_v33, %v3459_v34  ;;  %v3162_v1 = vor.u32 %v3841_v8, %v3161_v5  ;;  %v3869_v12 = vld [vmem:[#allocation3 + $0x1d4] sm:$0xf0] }
 0x1d0   :  { %2034 = vmatpush.bf16.msra.mxu1 %v3238_v2  ;;  %v3187_v42 = vld [vmem:[#allocation3 + $0x130] sm:$0xf0]  ;;  %v3878_v43 = vld [vmem:[#allocation3 + $0x224] sm:$0xf]  ;;  %v3062_v29 = vor.u32 %v3814_v36, %v3059_v37  ;;  %v3290_v2 = vor.u32 %v3873_v28, %v3289_v57  ;;  %v3401_v13 = vld [vmem:[#allocation3 + $0x2c8] sm:$0xf] }
 0x1d1   :  { %2047 = vmatpush.bf16.msra.mxu2 %v3366_v3  ;;  %v3315_v44 = vld [vmem:[#allocation3 + $0x230] sm:$0xf0]  ;;  %v3910_v46 = vld [vmem:[#allocation3 + $0x324] sm:$0xf]  ;;  %v3190_v51 = vor.u32 %v3846_v38, %v3187_v42  ;;  %v3418_v3 = vor.u32 %v3905_v60, %v3417_v20  ;;  %v3901_v16 = vld [vmem:[#allocation3 + $0x2d4] sm:$0xf0] }
 0x1d2   :  { %2060 = vmatpush.bf16.msra.mxu3 %v3494_v9  ;;  %v3443_v47 = vld [vmem:[#allocation3 + $0x330] sm:$0xf0]  ;;  %v3810_v50 = vld [vmem:[#allocation3 + $0x4] sm:$0xf]  ;;  %v3318_v40 = vor.u32 %v3878_v43, %v3315_v44  ;;  %v3546_v9 = vor.u32 %v3937_v63, %v3545_v62  ;;  %v3529_v17 = vld [vmem:[#allocation3 + $0x3c8] sm:$0xf] }
 0x1d3   :  { %2022 = vmatpush.bf16.msra.mxu0 %v3094_v23  ;;  %v3043_v39 = vld [vmem:[#allocation3 + $0x10] sm:$0xf0]  ;;  %v3842_v52 = vld [vmem:[#allocation3 + $0x104] sm:$0xf]  ;;  %v3446_v24 = vor.u32 %v3910_v46, %v3443_v47  ;;  %v3933_v22 = vld [vmem:[#allocation3 + $0x3d4] sm:$0xf0]  ;;  %v3146_v23 = vor.u32 %v3837_v6, %v3145_v4 }
 0x1d4   :  { %2035 = vmatpush.bf16.msra.mxu1 %v3222_v25  ;;  %v3171_v59 = vld [vmem:[#allocation3 + $0x110] sm:$0xf0]  ;;  %v3874_v53 = vld [vmem:[#allocation3 + $0x204] sm:$0xf]  ;;  %v3046_v58 = vor.u32 %v3810_v50, %v3043_v39  ;;  %v3274_v25 = vor.u32 %v3869_v12, %v3273_v7  ;;  %v3129_v18 = vld [vmem:[#allocation3 + $0xa8] sm:$0xf] }
 0x1d5   :  { %2048 = vmatpush.bf16.msra.mxu2 %v3350_v26  ;;  %v3299_v54 = vld [vmem:[#allocation3 + $0x210] sm:$0xf0]  ;;  %v3906_v55 = vld [vmem:[#allocation3 + $0x304] sm:$0xf]  ;;  %v3174_v27 = vor.u32 %v3842_v52, %v3171_v59  ;;  %v3402_v26 = vor.u32 %v3901_v16, %v3401_v13  ;;  %v3833_v19 = vld [vmem:[#allocation3 + $0xb4] sm:$0xf0] }
 0x1d6   :  { %2061 = vmatpush.bf16.msra.mxu3 %v3478_v31  ;;  %v3427_v56 = vld [vmem:[#allocation3 + $0x310] sm:$0xf0]  ;;  %v3302_v61 = vor.u32 %v3874_v53, %v3299_v54  ;;  %v3257_v30 = vld [vmem:[#allocation3 + $0x1a8] sm:$0xf]  ;;  %v3530_v31 = vor.u32 %v3933_v22, %v3529_v17  ;;  %v3865_v10 = vld [vmem:[#allocation3 + $0x1b4] sm:$0xf0] }
 0x1d7   :  { %2023 = vmatpush.bf16.msra.mxu0 %v3078_v35  ;;  %v3430_v0 = vor.u32 %v3906_v55, %v3427_v56  ;;  %v3385_v32 = vld [vmem:[#allocation3 + $0x2a8] sm:$0xf]  ;;  %v3897_v14 = vld [vmem:[#allocation3 + $0x2b4] sm:$0xf0]  ;;  %v3130_v35 = vor.u32 %v3833_v19, %v3129_v18 }
 0x1d8   :  { %2036 = vmatpush.bf16.msra.mxu1 %v3206_v11  ;;  %v3513_v33 = vld [vmem:[#allocation3 + $0x3a8] sm:$0xf]  ;;  %v3929_v34 = vld [vmem:[#allocation3 + $0x3b4] sm:$0xf0]  ;;  %v3258_v11 = vor.u32 %v3865_v10, %v3257_v30 }
 0x1d9   :  { %2049 = vmatpush.bf16.msra.mxu2 %v3334_v15  ;;  %v3386_v15 = vor.u32 %v3897_v14, %v3385_v32  ;;  %v3113_v36 = vld [vmem:[#allocation3 + $0x88] sm:$0xf]  ;;  %v3829_v37 = vld [vmem:[#allocation3 + $0x94] sm:$0xf0] }
 0x1da   :  { %2062 = vmatpush.bf16.msra.mxu3 %v3462_v41  ;;  %v3241_v38 = vld [vmem:[#allocation3 + $0x188] sm:$0xf]  ;;  %v3514_v41 = vor.u32 %v3929_v34, %v3513_v33  ;;  %v3861_v42 = vld [vmem:[#allocation3 + $0x194] sm:$0xf0] }
 0x1db   :  { %2024 = vmatpush.bf16.msra.mxu0 %v3062_v29  ;;  %v3369_v43 = vld [vmem:[#allocation3 + $0x288] sm:$0xf]  ;;  %v3893_v44 = vld [vmem:[#allocation3 + $0x294] sm:$0xf0]  ;;  %v3114_v29 = vor.u32 %v3829_v37, %v3113_v36  ;;  %v3242_v50 = vor.u32 %v3861_v42, %v3241_v38  ;;  %v3291_v37 = vld [vmem:[#allocation3 + $0x1f8] sm:$0xf0] }
 0x1dc   :  { %2037 = vmatpush.bf16.msra.mxu1 %v3190_v51  ;;  %v3497_v46 = vld [vmem:[#allocation3 + $0x388] sm:$0xf]  ;;  %v3925_v47 = vld [vmem:[#allocation3 + $0x394] sm:$0xf0]  ;;  %v3370_v39 = vor.u32 %v3893_v44, %v3369_v43  ;;  %v3903_v38 = vld [vmem:[#allocation3 + $0x2ec] sm:$0xf] }
 0x1dd   :  { %2050 = vmatpush.bf16.msra.mxu2 %v3318_v40  ;;  %v3097_v51 = vld [vmem:[#allocation3 + $0x68] sm:$0xf]  ;;  %v3825_v40 = vld [vmem:[#allocation3 + $0x74] sm:$0xf0]  ;;  %v3498_v59 = vor.u32 %v3925_v47, %v3497_v46  ;;  %v3935_v44 = vld [vmem:[#allocation3 + $0x3ec] sm:$0xf] }
 0x1de   :  { %2063 = vmatpush.bf16.msra.mxu3 %v3446_v24  ;;  %v3225_v52 = vld [vmem:[#allocation3 + $0x168] sm:$0xf]  ;;  %v3857_v53 = vld [vmem:[#allocation3 + $0x174] sm:$0xf0]  ;;  %v3098_v5 = vor.u32 %v3825_v40, %v3097_v51  ;;  %v3547_v46 = vld [vmem:[#allocation3 + $0x3f8] sm:$0xf0] }
 0x1df   :  { %2025 = vmatpush.bf16.msra.mxu0 %v3046_v58  ;;  %v3353_v24 = vld [vmem:[#allocation3 + $0x268] sm:$0xf]  ;;  %v3889_v54 = vld [vmem:[#allocation3 + $0x274] sm:$0xf0]  ;;  %v3226_v8 = vor.u32 %v3857_v53, %v3225_v52  ;;  %v3835_v51 = vld [vmem:[#allocation3 + $0xcc] sm:$0xf] }
 0x1e0   :  { %2038 = vmatpush.bf16.msra.mxu1 %v3174_v27  ;;  %v3481_v55 = vld [vmem:[#allocation3 + $0x368] sm:$0xf]  ;;  %v3921_v56 = vld [vmem:[#allocation3 + $0x374] sm:$0xf0]  ;;  %v3354_v57 = vor.u32 %v3889_v54, %v3353_v24  ;;  %v3147_v40 = vld [vmem:[#allocation3 + $0xd8] sm:$0xf0] }
 0x1e1   :  { %2051 = vmatpush.bf16.msra.mxu2 %v3302_v61  ;;  %v3081_v58 = vld [vmem:[#allocation3 + $0x48] sm:$0xf]  ;;  %v3821_v28 = vld [vmem:[#allocation3 + $0x54] sm:$0xf0]  ;;  %v3482_v60 = vor.u32 %v3921_v56, %v3481_v55  ;;  %v3867_v52 = vld [vmem:[#allocation3 + $0x1cc] sm:$0xf] }
 0x1e2   :  { %2064 = vmatpush.bf16.msra.mxu3 %v3430_v0  ;;  %2026 = vmatmul.bf16.vlgmr.msra.gmra.mxu0 %v4227_v49  ;;  %v3209_v20 = vld [vmem:[#allocation3 + $0x148] sm:$0xf]  ;;  %v3853_v27 = vld [vmem:[#allocation3 + $0x154] sm:$0xf0]  ;;  %v3275_v53 = vld [vmem:[#allocation3 + $0x1d8] sm:$0xf0] }
 0x1e3   :  { %2070 = vmatpush.bf16.msrb.mxu0 %v3162_v1  ;;  %2039 = vmatmul.bf16.vlgmr.msra.gmra.mxu1 %v4232_v21  ;;  %v3337_v61 = vld [vmem:[#allocation3 + $0x248] sm:$0xf]  ;;  %v3885_v62 = vld [vmem:[#allocation3 + $0x254] sm:$0xf0]  ;;  %v3082_v1 = vor.u32 %v3821_v28, %v3081_v58  ;;  %v3899_v24 = vld [vmem:[#allocation3 + $0x2cc] sm:$0xf] }
 0x1e4   :  { %2083 = vmatpush.bf16.msrb.mxu1 %v3290_v2  ;;  %2052 = vmatmul.bf16.vlgmr.msra.gmra.mxu2 %v4217_v45  ;;  %v3465_v63 = vld [vmem:[#allocation3 + $0x348] sm:$0xf]  ;;  %v3917_v0 = vld [vmem:[#allocation3 + $0x354] sm:$0xf0]  ;;  %v3210_v2 = vor.u32 %v3853_v27, %v3209_v20  ;;  %v3403_v54 = vld [vmem:[#allocation3 + $0x2d8] sm:$0xf0] }
 0x1e5   :  { %2096 = vmatpush.bf16.msrb.mxu2 %v3418_v3  ;;  %2065 = vmatmul.bf16.vlgmr.msra.gmra.mxu3 %v4222_v48  ;;  %v3338_v3 = vor.u32 %v3885_v62, %v3337_v61  ;;  %v3065_v4 = vld [vmem:[#allocation3 + $0x28] sm:$0xf]  ;;  %v3817_v6 = vld [vmem:[#allocation3 + $0x34] sm:$0xf0]  ;;  %v3931_v55 = vld [vmem:[#allocation3 + $0x3cc] sm:$0xf] }
 0x1e6   :  { %2109 = vmatpush.bf16.msrb.mxu3 %v3546_v9  ;;  %v3193_v7 = vld [vmem:[#allocation3 + $0x128] sm:$0xf]  ;;  %v3466_v9 = vor.u32 %v3917_v0, %v3465_v63  ;;  %v3849_v12 = vld [vmem:[#allocation3 + $0x134] sm:$0xf0]  ;;  %v3531_v56 = vld [vmem:[#allocation3 + $0x3d8] sm:$0xf0] }
 0x1e7   :  { %2071 = vmatpush.bf16.msrb.mxu0 %v3146_v23  ;;  %v3321_v13 = vld [vmem:[#allocation3 + $0x228] sm:$0xf]  ;;  %v3881_v16 = vld [vmem:[#allocation3 + $0x234] sm:$0xf0]  ;;  %v3066_v23 = vor.u32 %v3817_v6, %v3065_v4  ;;  %v3194_v18 = vor.u32 %v3849_v12, %v3193_v7  ;;  %v3831_v58 = vld [vmem:[#allocation3 + $0xac] sm:$0xf] }
 0x1e8   :  { %2084 = vmatpush.bf16.msrb.mxu1 %v3274_v25  ;;  %v3449_v17 = vld [vmem:[#allocation3 + $0x328] sm:$0xf]  ;;  %v3913_v22 = vld [vmem:[#allocation3 + $0x334] sm:$0xf0]  ;;  %v3322_v19 = vor.u32 %v3881_v16, %v3321_v13  ;;  %v3131_v28 = vld [vmem:[#allocation3 + $0xb8] sm:$0xf0] }
 0x1e9   :  { %2097 = vmatpush.bf16.msrb.mxu2 %v3402_v26  ;;  %v3049_v25 = vld [vmem:[#allocation3 + $0x8] sm:$0xf]  ;;  %v3813_v26 = vld [vmem:[#allocation3 + $0x14] sm:$0xf0]  ;;  %v3450_v32 = vor.u32 %v3913_v22, %v3449_v17  ;;  %v3863_v20 = vld [vmem:[#allocation3 + $0x1ac] sm:$0xf] }
 0x1ea   :  { %2110 = vmatpush.bf16.msrb.mxu3 %v3530_v31  ;;  %v3177_v30 = vld [vmem:[#allocation3 + $0x108] sm:$0xf]  ;;  %v3845_v31 = vld [vmem:[#allocation3 + $0x114] sm:$0xf0]  ;;  %v3050_v36 = vor.u32 %v3813_v26, %v3049_v25  ;;  %v3259_v27 = vld [vmem:[#allocation3 + $0x1b8] sm:$0xf0] }
 0x1eb   :  { %2072 = vmatpush.bf16.msrb.mxu0 %v3130_v35  ;;  %v3305_v10 = vld [vmem:[#allocation3 + $0x208] sm:$0xf]  ;;  %v3877_v14 = vld [vmem:[#allocation3 + $0x214] sm:$0xf0]  ;;  %v3839_v35 = vld [vmem:[#allocation3 + $0xec] sm:$0xf]  ;;  %v3178_v42 = vor.u32 %v3845_v31, %v3177_v30 }
 0x1ec   :  { %2085 = vmatpush.bf16.msrb.mxu1 %v3258_v11  ;;  %v3433_v33 = vld [vmem:[#allocation3 + $0x308] sm:$0xf]  ;;  %v3909_v34 = vld [vmem:[#allocation3 + $0x314] sm:$0xf0]  ;;  %v3163_v11 = vld [vmem:[#allocation3 + $0xf8] sm:$0xf0]  ;;  %v3306_v43 = vor.u32 %v3877_v14, %v3305_v10 }
 0x1ed   :  { %2098 = vmatpush.bf16.msrb.mxu2 %v3386_v15  ;;  %v3871_v15 = vld [vmem:[#allocation3 + $0x1ec] sm:$0xf]  ;;  %v3434_v47 = vor.u32 %v3909_v34, %v3433_v33  ;;  %v3387_v62 = vld [vmem:[#allocation3 + $0x2b8] sm:$0xf0] }
 0x1ee   :  { %2111 = vmatpush.bf16.msrb.mxu3 %v3514_v41  ;;  %v3419_v41 = vld [vmem:[#allocation3 + $0x2f8] sm:$0xf0]  ;;  %v3895_v61 = vld [vmem:[#allocation3 + $0x2ac] sm:$0xf] }
 0x1ef   :  { %2073 = vmatpush.bf16.msrb.mxu0 %v3114_v29  ;;  %v3166_v29 = vor.u32 %v3839_v35, %v3163_v11  ;;  %v3927_v63 = vld [vmem:[#allocation3 + $0x3ac] sm:$0xf]  ;;  %v3515_v0 = vld [vmem:[#allocation3 + $0x3b8] sm:$0xf0] }
 0x1f0   :  { %2086 = vmatpush.bf16.msrb.mxu1 %v3242_v50  ;;  %v3294_v50 = vor.u32 %v3871_v15, %v3291_v37  ;;  %v3827_v4 = vld [vmem:[#allocation3 + $0x8c] sm:$0xf]  ;;  %v3115_v6 = vld [vmem:[#allocation3 + $0x98] sm:$0xf0] }
 0x1f1   :  { %2099 = vmatpush.bf16.msrb.mxu2 %v3370_v39  ;;  %v3422_v39 = vor.u32 %v3903_v38, %v3419_v41  ;;  %v3859_v7 = vld [vmem:[#allocation3 + $0x18c] sm:$0xf]  ;;  %v3243_v12 = vld [vmem:[#allocation3 + $0x198] sm:$0xf0] }
 0x1f2   :  { %2112 = vmatpush.bf16.msrb.mxu3 %v3498_v59  ;;  %v3550_v59 = vor.u32 %v3935_v44, %v3547_v46  ;;  %v3891_v13 = vld [vmem:[#allocation3 + $0x28c] sm:$0xf]  ;;  %v3371_v16 = vld [vmem:[#allocation3 + $0x298] sm:$0xf0]  ;;  %v3246_v25 = vor.u32 %v3859_v7, %v3243_v12 }
 0x1f3   :  { %2074 = vmatpush.bf16.msrb.mxu0 %v3098_v5  ;;  %v3150_v5 = vor.u32 %v3835_v51, %v3147_v40  ;;  %v3923_v17 = vld [vmem:[#allocation3 + $0x38c] sm:$0xf]  ;;  %v3499_v22 = vld [vmem:[#allocation3 + $0x398] sm:$0xf0]  ;;  %v3374_v26 = vor.u32 %v3891_v13, %v3371_v16 }
 0x1f4   :  { %2087 = vmatpush.bf16.msrb.mxu1 %v3226_v8  ;;  %v3278_v8 = vor.u32 %v3867_v52, %v3275_v53  ;;  %v3855_v30 = vld [vmem:[#allocation3 + $0x16c] sm:$0xf]  ;;  %v3502_v31 = vor.u32 %v3923_v17, %v3499_v22  ;;  %v3227_v10 = vld [vmem:[#allocation3 + $0x178] sm:$0xf0] }
 0x1f5   :  { %2100 = vmatpush.bf16.msrb.mxu2 %v3354_v57  ;;  %v3406_v57 = vor.u32 %v3899_v24, %v3403_v54  ;;  %v3355_v14 = vld [vmem:[#allocation3 + $0x278] sm:$0xf0]  ;;  %v3919_v33 = vld [vmem:[#allocation3 + $0x36c] sm:$0xf]  ;;  %v3230_v11 = vor.u32 %v3855_v30, %v3227_v10 }
 0x1f6   :  { %2113 = vmatpush.bf16.msrb.mxu3 %v3482_v60  ;;  %v3534_v60 = vor.u32 %v3931_v55, %v3531_v56  ;;  %v3483_v34 = vld [vmem:[#allocation3 + $0x378] sm:$0xf0]  ;;  %v3851_v38 = vld [vmem:[#allocation3 + $0x14c] sm:$0xf] }
 0x1f7   :  { %2075 = vmatpush.bf16.msrb.mxu0 %v3082_v1  ;;  %v3134_v1 = vor.u32 %v3831_v58, %v3131_v28  ;;  %v3083_v37 = vld [vmem:[#allocation3 + $0x58] sm:$0xf0]  ;;  %v3486_v41 = vor.u32 %v3919_v33, %v3483_v34  ;;  %v3915_v46 = vld [vmem:[#allocation3 + $0x34c] sm:$0xf] }
 0x1f8   :  { %2088 = vmatpush.bf16.msrb.mxu1 %v3210_v2  ;;  %v3262_v2 = vor.u32 %v3863_v20, %v3259_v27  ;;  %v3339_v44 = vld [vmem:[#allocation3 + $0x258] sm:$0xf0]  ;;  %v3815_v51 = vld [vmem:[#allocation3 + $0x2c] sm:$0xf] }
 0x1f9   :  { %2101 = vmatpush.bf16.msrb.mxu2 %v3338_v3  ;;  %v3390_v3 = vor.u32 %v3895_v61, %v3387_v62  ;;  %v3067_v40 = vld [vmem:[#allocation3 + $0x38] sm:$0xf0]  ;;  %v3847_v52 = vld [vmem:[#allocation3 + $0x12c] sm:$0xf] }
 0x1fa   :  { %2114 = vmatpush.bf16.msrb.mxu3 %v3466_v9  ;;  %v3518_v9 = vor.u32 %v3927_v63, %v3515_v0  ;;  %v3195_v53 = vld [vmem:[#allocation3 + $0x138] sm:$0xf0]  ;;  %v3879_v24 = vld [vmem:[#allocation3 + $0x22c] sm:$0xf] }
 0x1fb   :  { %2076 = vmatpush.bf16.msrb.mxu0 %v3066_v23  ;;  %v3118_v23 = vor.u32 %v3827_v4, %v3115_v6  ;;  %v3323_v54 = vld [vmem:[#allocation3 + $0x238] sm:$0xf0]  ;;  %v3911_v55 = vld [vmem:[#allocation3 + $0x32c] sm:$0xf]  ;;  %v1316_v6 = vld [vmem:[%s4289_s6] sm:$0xf] }
 0x1fc   :  { %2089 = vmatpush.bf16.msrb.mxu1 %v3194_v18  ;;  %v3823_v18 = vld [vmem:[#allocation3 + $0x6c] sm:$0xf]  ;;  %v3451_v56 = vld [vmem:[#allocation3 + $0x338] sm:$0xf0]  ;;  %v1318_v7 = vperm.slane %v1316_v6, 0 }
 0x1fd   :  { %2102 = vmatpush.bf16.msrb.mxu2 %v3322_v19  ;;  %v3099_v19 = vld [vmem:[#allocation3 + $0x78] sm:$0xf0]  ;;  %v3811_v58 = vld [vmem:[#allocation3 + $0xc] sm:$0xf] }
 0x1fe   :  { %2115 = vmatpush.bf16.msrb.mxu3 %v3450_v32  ;;  %v3887_v32 = vld [vmem:[#allocation3 + $0x26c] sm:$0xf]  ;;  %v3102_v35 = vor.u32 %v3823_v18, %v3099_v19  ;;  %v3051_v28 = vld [vmem:[#allocation3 + $0x18] sm:$0xf0]  ;;  %v1319_v18 = vperm.slane %v1316_v6, 1 }
 0x1ff   :  { %2077 = vmatpush.bf16.msrb.mxu0 %v3050_v36  ;;  %v3358_v15 = vor.u32 %v3887_v32, %v3355_v14  ;;  %v3819_v36 = vld [vmem:[#allocation3 + $0x4c] sm:$0xf]  ;;  %v3179_v27 = vld [vmem:[#allocation3 + $0x118] sm:$0xf0] }
 0x200   :  { %2090 = vmatpush.bf16.msrb.mxu1 %v3178_v42  ;;  %v3211_v42 = vld [vmem:[#allocation3 + $0x158] sm:$0xf0]  ;;  %v3843_v20 = vld [vmem:[#allocation3 + $0x10c] sm:$0xf] }
 0x201   :  { %2103 = vmatpush.bf16.msrb.mxu2 %v3306_v43  ;;  %v3883_v43 = vld [vmem:[#allocation3 + $0x24c] sm:$0xf]  ;;  %v3307_v62 = vld [vmem:[#allocation3 + $0x218] sm:$0xf0] }
 0x202   :  { %2116 = vmatpush.bf16.msrb.mxu3 %v3434_v47  ;;  %2078 = vmatmul.bf16.vlgmr.msrb.gmra.mxu0 %v4227_v49  ;;  %v3467_v47 = vld [vmem:[#allocation3 + $0x358] sm:$0xf0]  ;;  %v3875_v61 = vld [vmem:[#allocation3 + $0x20c] sm:$0xf] }
 0x203   :  { %2122 = vmatpush.bf16.msra.mxu0 %v3166_v29  ;;  %2091 = vmatmul.bf16.vlgmr.msrb.gmra.mxu1 %v4232_v21  ;;  %v3086_v29 = vor.u32 %v3819_v36, %v3083_v37  ;;  %v3907_v63 = vld [vmem:[#allocation3 + $0x30c] sm:$0xf]  ;;  %v3435_v0 = vld [vmem:[#allocation3 + $0x318] sm:$0xf0] }
 0x204   :  { %2135 = vmatpush.bf16.msra.mxu1 %v3294_v50  ;;  %2104 = vmatmul.bf16.vlgmr.msrb.gmra.mxu2 %v4217_v45  ;;  %v3214_v50 = vor.u32 %v3851_v38, %v3211_v42  ;;  %v3438_v4 = vor.u32 %v3907_v63, %v3435_v0  ;;  %v1320_v38 = vperm.slane %v1316_v6, 2 }
 0x205   :  { %2148 = vmatpush.bf16.msra.mxu2 %v3422_v39  ;;  %2117 = vmatmul.bf16.vlgmr.msrb.gmra.mxu3 %v4222_v48  ;;  %v3342_v39 = vor.u32 %v3883_v43, %v3339_v44 }
 0x206   :  { %2161 = vmatpush.bf16.msra.mxu3 %v3550_v59  ;;  %v3470_v59 = vor.u32 %v3915_v46, %v3467_v47 }
 0x207   :  { %2123 = vmatpush.bf16.msra.mxu0 %v3150_v5  ;;  %v3070_v5 = vor.u32 %v3815_v51, %v3067_v40 }
 0x208   :  { %2136 = vmatpush.bf16.msra.mxu1 %v3278_v8  ;;  %v3198_v8 = vor.u32 %v3847_v52, %v3195_v53  ;;  %v1321_v53 = vperm.slane %v1316_v6, 3 }
 0x209   :  { %2149 = vmatpush.bf16.msra.mxu2 %v3406_v57  ;;  %v3326_v57 = vor.u32 %v3879_v24, %v3323_v54 }
 0x20a   :  { %2162 = vmatpush.bf16.msra.mxu3 %v3534_v60  ;;  %v3454_v60 = vor.u32 %v3911_v55, %v3451_v56 }
 0x20b   :  { %2124 = vmatpush.bf16.msra.mxu0 %v3134_v1  ;;  %v3054_v1 = vor.u32 %v3811_v58, %v3051_v28 }
 0x20c   :  { %2137 = vmatpush.bf16.msra.mxu1 %v3262_v2  ;;  %v3182_v2 = vor.u32 %v3843_v20, %v3179_v27 }
 0x20d   :  { %2150 = vmatpush.bf16.msra.mxu2 %v3390_v3  ;;  %v3310_v3 = vor.u32 %v3875_v61, %v3307_v62 }
 0x20e   :  { %2163 = vmatpush.bf16.msra.mxu3 %v3518_v9 }
 0x20f   :  { %2125 = vmatpush.bf16.msra.mxu0 %v3118_v23 }
 0x210   :  { %2138 = vmatpush.bf16.msra.mxu1 %v3246_v25 }
 0x211   :  { %2151 = vmatpush.bf16.msra.mxu2 %v3374_v26 }
 0x212   :  { %2164 = vmatpush.bf16.msra.mxu3 %v3502_v31 }
 0x213   :  { %2126 = vmatpush.bf16.msra.mxu0 %v3102_v35 }
 0x214   :  { %2139 = vmatpush.bf16.msra.mxu1 %v3230_v11 }
 0x215   :  { %2152 = vmatpush.bf16.msra.mxu2 %v3358_v15 }
 0x216   :  { %2165 = vmatpush.bf16.msra.mxu3 %v3486_v41 }
 0x217   :  { %2127 = vmatpush.bf16.msra.mxu0 %v3086_v29 }
 0x218   :  { %2140 = vmatpush.bf16.msra.mxu1 %v3214_v50 }
 0x219   :  { %2153 = vmatpush.bf16.msra.mxu2 %v3342_v39 }
 0x21a   :  { %2166 = vmatpush.bf16.msra.mxu3 %v3470_v59 }
 0x21b   :  { %2128 = vmatpush.bf16.msra.mxu0 %v3070_v5 }
 0x21c   :  { %2141 = vmatpush.bf16.msra.mxu1 %v3198_v8 }
 0x21d   :  { %2154 = vmatpush.bf16.msra.mxu2 %v3326_v57 }
 0x21e   :  { %2167 = vmatpush.bf16.msra.mxu3 %v3454_v60 }
 0x21f   :  { %2129 = vmatpush.bf16.msra.mxu0 %v3054_v1 }
 0x220   :  { %2142 = vmatpush.bf16.msra.mxu1 %v3182_v2 }
 0x221   :  { %2155 = vmatpush.bf16.msra.mxu2 %v3310_v3 }
 0x222   :  { %2168 = vmatpush.bf16.msra.mxu3 %v3438_v4  ;;  %2130 = vmatmul.bf16.vlgmr.msra.gmra.mxu0 %v4227_v49 }
 0x223   :  { %2143 = vmatmul.bf16.vlgmr.msra.gmra.mxu1 %v4232_v21 }
 0x224   :  { %2156 = vmatmul.bf16.vlgmr.msra.gmra.mxu2 %v4217_v45 }
 0x225   :  { %2169 = vmatmul.bf16.vlgmr.msra.gmra.mxu3 %v4222_v48 }
 0x23f   :  { %v1975_v9 = vpop.f32.mrf.mxu0 }
 0x240   :  { %v1976_v12 = vadd.f32 %v1975_v9, %v1318_v7  ;;  %v1988_v13 = vpop.f32.mrf.mxu1 }
 0x242   :  { %v1989_v16 = vadd.f32 %v1988_v13, %v1976_v12 }
 0x247   :  { %v2001_v17 = vpop.f32.mrf.mxu2  ;;  %v1977_v49 = vpop.f32.mrf.mxu0 }
 0x248   :  { %v2002_v22 = vadd.f32 %v2001_v17, %v1989_v16  ;;  %v2014_v23 = vpop.f32.mrf.mxu3  ;;  %v1990_v21 = vpop.f32.mrf.mxu1 }
 0x24a   :  { %v4253_v25 = vadd.f32 %v2014_v23, %v2002_v22 }
 0x24c   :  { %v2174_v45 = vmax.f32 %v4253_v25, 0.0 }
 0x24f   :  { %v2003_v26 = vpop.f32.mrf.mxu2 }
 0x250   :  { %v2016_v48 = vpop.f32.mrf.mxu3 }
 0x25f   :  { %v2027_v19 = vpop.f32.mrf.mxu0 }
 0x260   :  { %v2028_v30 = vadd.f32 %v2027_v19, %v1319_v18  ;;  %v2040_v31 = vpop.f32.mrf.mxu1 }
 0x262   :  { %v2041_v10 = vadd.f32 %v2040_v31, %v2028_v30 }
 0x267   :  { %v2053_v32 = vpop.f32.mrf.mxu2  ;;  %v2029_v35 = vpop.f32.mrf.mxu0 }
 0x268   :  { %v2054_v14 = vadd.f32 %v2053_v32, %v2041_v10  ;;  %v2066_v33 = vpop.f32.mrf.mxu3  ;;  %v2042_v11 = vpop.f32.mrf.mxu1 }
 0x26a   :  { %v4256_v34 = vadd.f32 %v2066_v33, %v2054_v14 }
 0x26c   :  { %v2175_v15 = vmax.f32 %v4256_v34, 0.0 }
 0x26f   :  { %v2055_v36 = vpop.f32.mrf.mxu2 }
 0x270   :  { %v2068_v37 = vpop.f32.mrf.mxu3 }
 0x27f   :  { %v2079_v41 = vpop.f32.mrf.mxu0 }
 0x280   :  { %v2080_v42 = vadd.f32 %v2079_v41, %v1320_v38  ;;  %v2092_v43 = vpop.f32.mrf.mxu1 }
 0x282   :  { %v2093_v44 = vadd.f32 %v2092_v43, %v2080_v42 }
 0x287   :  { %v2105_v46 = vpop.f32.mrf.mxu2  ;;  %v2081_v39 = vpop.f32.mrf.mxu0 }
 0x288   :  { %v2106_v47 = vadd.f32 %v2105_v46, %v2093_v44  ;;  %v2118_v29 = vpop.f32.mrf.mxu3  ;;  %v2094_v51 = vpop.f32.mrf.mxu1 }
 0x28a   :  { %v4259_v50 = vadd.f32 %v2118_v29, %v2106_v47 }
 0x28c   :  { %v2176_v40 = vmax.f32 %v4259_v50, 0.0 }
 0x28f   :  { %v2107_v52 = vpop.f32.mrf.mxu2 }
 0x290   :  { %v2120_v59 = vpop.f32.mrf.mxu3 }
 0x29f   :  { %v2131_v24 = vpop.f32.mrf.mxu0 }
 0x2a0   :  { %v2132_v54 = vadd.f32 %v2131_v24, %v1321_v53  ;;  %v2144_v55 = vpop.f32.mrf.mxu1 }
 0x2a2   :  { %v2145_v56 = vadd.f32 %v2144_v55, %v2132_v54 }
 0x2a7   :  { %v2157_v5 = vpop.f32.mrf.mxu2  ;;  %v2133_v58 = vpop.f32.mrf.mxu0 }
 0x2a8   :  { %v2158_v8 = vadd.f32 %v2157_v5, %v2145_v56  ;;  %v2170_v57 = vpop.f32.mrf.mxu3  ;;  %v2146_v28 = vpop.f32.mrf.mxu1 }
 0x2aa   :  { %v4262_v20 = vadd.f32 %v2170_v57, %v2158_v8 }
 0x2ac   :  { %v2177_v60 = vmax.f32 %v4262_v20, 0.0 }
 0x2af   :  { %v2159_v27 = vpop.f32.mrf.mxu2 }
 0x2b0   :  { %v2172_v61 = vpop.f32.mrf.mxu3 }
 0x2b1   :  { %4077 = dma.done.wait [#allocation5 + $0x2], 4096 }
 0x2b2   :  { %4078 = vsyncadd [#allocation5 + $0x2], 4294963200  ;;  %v3945_v62 = vld [vmem:[#allocation4 + $0x38] sm:$0xff]  ;;  %v3944_v2 = vld [vmem:[#allocation4 + $0x30] sm:$0xff]  ;;  %v2181_v38 = vpack.c.bf16 %v2174_v45, %v2174_v45  ;;  %v2182_v41 = vpack.c.bf16 %v2175_v15, %v2175_v15  ;;  %v2183_v42 = vpack.c.bf16 %v2176_v40, %v2176_v40  ;;  %v2184_v43 = vpack.c.bf16 %v2177_v60, %v2177_v60 }
 0x2b3   :  { %v3953_v63 = vld [vmem:[#allocation4 + $0x78] sm:$0xff]  ;;  %2445 = vmatpush.bf16.msrb.mxu0 %v3945_v62  ;;  %v3952_v3 = vld [vmem:[#allocation4 + $0x70] sm:$0xff]  ;;  %v3943_v7 = vld [vmem:[#allocation4 + $0x28] sm:$0xff] }
 0x2b4   :  { %v3961_v0 = vld [vmem:[#allocation4 + $0xb8] sm:$0xff]  ;;  %2458 = vmatpush.bf16.msrb.mxu1 %v3953_v63  ;;  %v3960_v4 = vld [vmem:[#allocation4 + $0xb0] sm:$0xff]  ;;  %v3951_v9 = vld [vmem:[#allocation4 + $0x68] sm:$0xff] }
 0x2b5   :  { %v3969_v1 = vld [vmem:[#allocation4 + $0xf8] sm:$0xff]  ;;  %2471 = vmatpush.bf16.msrb.mxu2 %v3961_v0  ;;  %v3968_v6 = vld [vmem:[#allocation4 + $0xf0] sm:$0xff]  ;;  %v3959_v12 = vld [vmem:[#allocation4 + $0xa8] sm:$0xff] }
 0x2b6   :  { %2484 = vmatpush.bf16.msrb.mxu3 %v3969_v1  ;;  %v3967_v13 = vld [vmem:[#allocation4 + $0xe8] sm:$0xff]  ;;  %v3942_v16 = vld [vmem:[#allocation4 + $0x20] sm:$0xff]  ;;  %v3941_v49 = vld [vmem:[#allocation4 + $0x18] sm:$0xff] }
 0x2b7   :  { %2446 = vmatpush.bf16.msrb.mxu0 %v3944_v2  ;;  %v3950_v17 = vld [vmem:[#allocation4 + $0x60] sm:$0xff]  ;;  %v3949_v21 = vld [vmem:[#allocation4 + $0x58] sm:$0xff]  ;;  %v3940_v18 = vld [vmem:[#allocation4 + $0x10] sm:$0xff] }
 0x2b8   :  { %2459 = vmatpush.bf16.msrb.mxu1 %v3952_v3  ;;  %v3958_v22 = vld [vmem:[#allocation4 + $0xa0] sm:$0xff]  ;;  %v3957_v26 = vld [vmem:[#allocation4 + $0x98] sm:$0xff]  ;;  %v3948_v19 = vld [vmem:[#allocation4 + $0x50] sm:$0xff] }
 0x2b9   :  { %2472 = vmatpush.bf16.msrb.mxu2 %v3960_v4  ;;  %v3966_v23 = vld [vmem:[#allocation4 + $0xe0] sm:$0xff]  ;;  %v3965_v48 = vld [vmem:[#allocation4 + $0xd8] sm:$0xff]  ;;  %v3956_v30 = vld [vmem:[#allocation4 + $0x90] sm:$0xff] }
 0x2ba   :  { %2485 = vmatpush.bf16.msrb.mxu3 %v3968_v6  ;;  %v3964_v31 = vld [vmem:[#allocation4 + $0xd0] sm:$0xff]  ;;  %v3939_v10 = vld [vmem:[#allocation4 + $0x8] sm:$0xff]  ;;  %v3938_v35 = vld [vmem:[#allocation4] sm:$0xff] }
 0x2bb   :  { %2447 = vmatpush.bf16.msrb.mxu0 %v3943_v7  ;;  %v3947_v32 = vld [vmem:[#allocation4 + $0x48] sm:$0xff]  ;;  %v3946_v11 = vld [vmem:[#allocation4 + $0x40] sm:$0xff] }
 0x2bc   :  { %2460 = vmatpush.bf16.msrb.mxu1 %v3951_v9  ;;  %v3955_v14 = vld [vmem:[#allocation4 + $0x88] sm:$0xff]  ;;  %v3954_v36 = vld [vmem:[#allocation4 + $0x80] sm:$0xff] }
 0x2bd   :  { %2473 = vmatpush.bf16.msrb.mxu2 %v3959_v12  ;;  %v3963_v33 = vld [vmem:[#allocation4 + $0xc8] sm:$0xff]  ;;  %v3962_v37 = vld [vmem:[#allocation4 + $0xc0] sm:$0xff] }
 0x2be   :  { %2486 = vmatpush.bf16.msrb.mxu3 %v3967_v13  ;;  %v3974_v25 = vld [vmem:[%s4291_s8] ss:$0 sm:$0xff] }
 0x2bf   :  { %2448 = vmatpush.bf16.msrb.mxu0 %v3942_v16 }
 0x2c0   :  { %2461 = vmatpush.bf16.msrb.mxu1 %v3950_v17 }
 0x2c1   :  { %2474 = vmatpush.bf16.msrb.mxu2 %v3958_v22 }
 0x2c2   :  { %2487 = vmatpush.bf16.msrb.mxu3 %v3966_v23 }
 0x2c3   :  { %2449 = vmatpush.bf16.msrb.mxu0 %v3941_v49 }
 0x2c4   :  { %2462 = vmatpush.bf16.msrb.mxu1 %v3949_v21 }
 0x2c5   :  { %2475 = vmatpush.bf16.msrb.mxu2 %v3957_v26 }
 0x2c6   :  { %2488 = vmatpush.bf16.msrb.mxu3 %v3965_v48 }
 0x2c7   :  { %2450 = vmatpush.bf16.msrb.mxu0 %v3940_v18 }
 0x2c8   :  { %2463 = vmatpush.bf16.msrb.mxu1 %v3948_v19 }
 0x2c9   :  { %2476 = vmatpush.bf16.msrb.mxu2 %v3956_v30 }
 0x2ca   :  { %2489 = vmatpush.bf16.msrb.mxu3 %v3964_v31 }
 0x2cb   :  { %2451 = vmatpush.bf16.msrb.mxu0 %v3939_v10 }
 0x2cc   :  { %2464 = vmatpush.bf16.msrb.mxu1 %v3947_v32 }
 0x2cd   :  { %2477 = vmatpush.bf16.msrb.mxu2 %v3955_v14 }
 0x2ce   :  { %2490 = vmatpush.bf16.msrb.mxu3 %v3963_v33 }
 0x2cf   :  { %2452 = vmatpush.bf16.msrb.mxu0 %v3938_v35 }
 0x2d0   :  { %2465 = vmatpush.bf16.msrb.mxu1 %v3946_v11 }
 0x2d1   :  { %2478 = vmatpush.bf16.msrb.mxu2 %v3954_v36 }
 0x2d2   :  { %2491 = vmatpush.bf16.msrb.mxu3 %v3962_v37  ;;  %2453 = vmatmul.bf16.vlgmr.msrb.gmra.mxu0 %v2181_v38 }
 0x2d3   :  { %2466 = vmatmul.bf16.vlgmr.msrb.gmra.mxu1 %v2182_v41 }
 0x2d4   :  { %2479 = vmatmul.bf16.vlgmr.msrb.gmra.mxu2 %v2183_v42 }
 0x2d5   :  { %2492 = vmatmul.bf16.vlgmr.msrb.gmra.mxu3 %v2184_v43 }
 0x34f   :  { %v2454_v45 = vpop.f32.mrf.mxu0 }
 0x350   :  { %v2467_v34 = vpop.f32.mrf.mxu1  ;;  %v2455_v15 = vadd.f32 %v3974_v25, %v2454_v45 }
 0x352   :  { %v2468_v44 = vadd.f32 %v2467_v34, %v2455_v15 }
 0x357   :  { %v2480_v46 = vpop.f32.mrf.mxu2  ;;  %v2456_v50 = vpop.f32.mrf.mxu0 }
 0x358   :  { %v2493_v47 = vpop.f32.mrf.mxu3  ;;  %v2481_v29 = vadd.f32 %v2480_v46, %v2468_v44  ;;  %v2469_v39 = vpop.f32.mrf.mxu1 }
 0x35a   :  { %v2494_v51 = vadd.f32 %v2493_v47, %v2481_v29 }
 0x35c   :  { %2497 = vst [vmem:[%s4292_s9] sm:$0xff] %v2494_v51 }
 0x35f   :  { %v2482_v40 = vpop.f32.mrf.mxu2 }
 0x360   :  { %v2495_v52 = vpop.f32.mrf.mxu3 }
 0x361   :  { %2502 = vsyncpa [#allocation7], 1 }
 0x362   :  { %2503 = vsyncmov [#allocation5] }
 0x365   :  { %s2504_s12 = vpop.sfrf %2503 }
 0x366   :  { %p3679_p0 = scmp.ne.s32.totalorder %s2504_s12, 0 }
 0x368   :  { %2508 = shalt.err (%p3679_p0)  }
 0x369   :  { %2510 = vsyncmov [#allocation5 + $0x1] }
 0x36c   :  { %s2511_s8 = vpop.sfrf %2510 }
 0x36d   :  { %p3680_p1 = scmp.ne.s32.totalorder %s2511_s8, 0 }
 0x36f   :  { %2515 = shalt.err (%p3680_p1)  }
 0x370   :  { %2517 = vsyncmov [#allocation5 + $0x2] }
 0x373   :  { %s2518_s13 = vpop.sfrf %2517 }
 0x374   :  { %p3681_p2 = scmp.ne.s32.totalorder %s2518_s13, 0 }
 0x376   :  { %2522 = shalt.err (%p3681_p2)  }

</bundles_post_ra>
